<compile_context>
chip_gen: v7x
topology: tpu7x:2x2x1
jax: 0.10.0
libtpu: 0.0.40
codegen_flags: <defaults>
</compile_context>

<pallas_src>
import math
import functools

import jax
import jax.numpy as jnp
from jax import lax
from jax.experimental import pallas as pl
from jax.experimental.pallas import tpu as pltpu


# dot_general dimension numbers (2-D, no batch dims)
_AxB = (((1,), (0,)), ((), ()))    # A @ B
_AxBT = (((1,), (1,)), ((), ()))   # A @ B^T


def _pick_tile(n, preferred=(256, 128)):
    """Largest preferred tile that divides n; fall back to the full dim.

    Tiles are either multiples of 128 (lane width / MXU-friendly) or the whole
    dimension, which keeps every BlockSpec inside the (8, 128) divisibility
    rule and keeps VMEM usage bounded regardless of N."""
    for t in preferred:
        if n >= t and n % t == 0:
            return t
    return n


def _qkv_proj_kernel(x_ref, wq_ref, wk_ref, wv_ref, qT_ref, k_ref, vT_ref):
    """Per-(head, row-tile) Q/K/V projections.

    x_ref : (TR, D)                    wq/wk/wv_ref : (d_k|d_v, D)  (PyTorch (out,in))
    qT_ref: (d_k, TR)  vT_ref: (d_v, TR)   -- stored (feature, token): lane-dense
    k_ref : (TR, d_k)                       -- stored (token, feature) so the flash
                                               kernel's K@Q^T is a plain matmul.
    1/sqrt(d_k) is already folded into W_Q.
    """
    x = x_ref[...]
    qT_ref[...] = lax.dot_general(wq_ref[...], x, _AxBT,
                                  preferred_element_type=jnp.float32).astype(qT_ref.dtype)
    k_ref[...] = lax.dot_general(x, wk_ref[...], _AxBT,
                                 preferred_element_type=jnp.float32).astype(k_ref.dtype)
    vT_ref[...] = lax.dot_general(wv_ref[...], x, _AxBT,
                                  preferred_element_type=jnp.float32).astype(vT_ref.dtype)


def _flash_attn_kernel(qT_ref, k_ref, vT_ref, oT_ref, m_sc, l_sc, acc_sc, *,
                       approx_recip):
    """Online-softmax attention for one (head, q-block); KV tiles on grid axis 2.

    qT_ref : (d_k, TQ)   k_ref : (TKV, d_k)   vT_ref : (d_v, TKV)
    oT_ref : (d_v, TQ)   -- context^T, lane-dense along the query axis
    scratch: m_sc/l_sc (1, TQ) f32 running max / denominator, acc_sc (d_v, TQ) f32
    """
    ki = pl.program_id(2)

    @pl.when(ki == 0)
    def _():
        m_sc[...] = jnp.full(m_sc.shape, -jnp.inf, m_sc.dtype)
        l_sc[...] = jnp.zeros(l_sc.shape, l_sc.dtype)
        acc_sc[...] = jnp.zeros(acc_sc.shape, acc_sc.dtype)

    # scores^T = K @ Q^T  (scale already folded into W_Q), f32 MXU accumulation.
    sT = lax.dot_general(k_ref[...], qT_ref[...], _AxB,
                         preferred_element_type=jnp.float32)            # (TKV, TQ)

    m_prev = m_sc[...]                                                  # (1, TQ)
    m_new = jnp.maximum(m_prev, jnp.max(sT, axis=0, keepdims=True))     # (1, TQ)
    alpha = jnp.exp(m_prev - m_new)                                     # (1, TQ)
    pT = jnp.exp(sT - m_new)                                            # (TKV, TQ) f32

    l_sc[...] = alpha * l_sc[...] + jnp.sum(pT, axis=0, keepdims=True)
    # context^T += V^T @ P^T   (plain matmul over the KV axis)
    acc_sc[...] = alpha * acc_sc[...] + lax.dot_general(
        vT_ref[...], pT.astype(vT_ref.dtype), _AxB,
        preferred_element_type=jnp.float32)                             # (d_v, TQ)
    m_sc[...] = m_new

    @pl.when(ki == pl.num_programs(2) - 1)
    def _():
        # deferred normalisation: one reciprocal per query (EUP), not an NxN divide
        inv_l = pl.reciprocal(l_sc[...], approx=approx_recip)           # (1, TQ)
        oT_ref[...] = (acc_sc[...] * inv_l).astype(oT_ref.dtype)


def _fc_kernel(r_ref, w_ref, o_ref):
    """out = R @ W_fc^T for one (row-tile, col-tile). r_ref:(TR,D)  w_ref:(TC,D)."""
    o_ref[...] = lax.dot_general(r_ref[...], w_ref[...], _AxBT,
                                 preferred_element_type=jnp.float32).astype(o_ref.dtype)


def prepare_mha_params(w_q, w_k, w_v, w_fc, n_heads, compute_dtype=jnp.float32):
    """One-time parameter prep (call once at init, NOT per forward):
    head-split the PyTorch (out_features, in_features) weights with a pure
    reshape (no transposes) and fold 1/sqrt(d_k) into W_Q."""
    D = w_q.shape[1]
    d_k = w_q.shape[0] // n_heads
    d_v = w_v.shape[0] // n_heads
    scale = 1.0 / math.sqrt(d_k)
    wq_h = (w_q * scale).reshape(n_heads, d_k, D).astype(compute_dtype)
    wk_h = w_k.reshape(n_heads, d_k, D).astype(compute_dtype)
    wv_h = w_v.reshape(n_heads, d_v, D).astype(compute_dtype)
    wfc = w_fc.astype(compute_dtype)
    return wq_h, wk_h, wv_h, wfc


@functools.partial(jax.jit, static_argnames=("approx_recip",))
def multi_head_attention(x, wq_h, wk_h, wv_h, wfc, *, approx_recip=False):
    """Forward pass matching MultiHeadAttention.forward exactly."""
    N, D = x.shape
    n_heads, d_k, _ = wq_h.shape
    d_v = wv_h.shape[1]
    out_dim = wfc.shape[0]
    compute_dtype = wq_h.dtype
    x = x.astype(compute_dtype)

    TR = _pick_tile(N)    # token row tile (projection / fc)
    TQ = _pick_tile(N)    # query tile
    TKV = _pick_tile(N)   # key/value tile

    # ---- 1) per-head QKV projections (heads on a grid axis) -----------------
    qT, k_all, vT = pl.pallas_call(
        _qkv_proj_kernel,
        grid=(n_heads, N // TR),
        in_specs=[
            pl.BlockSpec((TR, D), lambda h, r: (r, 0)),
            pl.BlockSpec((None, d_k, D), lambda h, r: (h, 0, 0)),
            pl.BlockSpec((None, d_k, D), lambda h, r: (h, 0, 0)),
            pl.BlockSpec((None, d_v, D), lambda h, r: (h, 0, 0)),
        ],
        out_specs=[
            pl.BlockSpec((None, d_k, TR), lambda h, r: (h, 0, r)),
            pl.BlockSpec((None, TR, d_k), lambda h, r: (h, r, 0)),
            pl.BlockSpec((None, d_v, TR), lambda h, r: (h, 0, r)),
        ],
        out_shape=[
            jax.ShapeDtypeStruct((n_heads, d_k, N), compute_dtype),   # Q^T
            jax.ShapeDtypeStruct((n_heads, N, d_k), compute_dtype),   # K
            jax.ShapeDtypeStruct((n_heads, d_v, N), compute_dtype),   # V^T
        ],
        compiler_params=pltpu.CompilerParams(
            dimension_semantics=("parallel", "parallel"),
            vmem_limit_bytes=32 * 1024 * 1024),
    )(x, wq_h, wk_h, wv_h)

    # ---- 2) flash attention: grid (head, q-block, kv-block) -----------------
    ctxT = pl.pallas_call(
        functools.partial(_flash_attn_kernel, approx_recip=approx_recip),
        grid=(n_heads, N // TQ, N // TKV),
        in_specs=[
            pl.BlockSpec((None, d_k, TQ), lambda h, qi, ki: (h, 0, qi)),
            pl.BlockSpec((None, TKV, d_k), lambda h, qi, ki: (h, ki, 0)),
            pl.BlockSpec((None, d_v, TKV), lambda h, qi, ki: (h, 0, ki)),
        ],
        out_specs=pl.BlockSpec((None, d_v, TQ), lambda h, qi, ki: (h, 0, qi)),
        out_shape=jax.ShapeDtypeStruct((n_heads, d_v, N), compute_dtype),
        scratch_shapes=[
            pltpu.VMEM((1, TQ), jnp.float32),     # running max
            pltpu.VMEM((1, TQ), jnp.float32),     # running denominator
            pltpu.VMEM((d_v, TQ), jnp.float32),   # running context^T
        ],
        compiler_params=pltpu.CompilerParams(
            dimension_semantics=("parallel", "parallel", "arbitrary"),
            vmem_limit_bytes=32 * 1024 * 1024),
    )(qT, k_all, vT)

    # Faithful reproduction of the module's odd recombination
    #   scores.transpose(1, 2).reshape(-1, H*d_v)
    # ctxT already IS scores.transpose(1, 2), so this is a plain reshape
    # (no XLA transpose op).  Because this reshape interleaves query positions
    # across output rows, the fc matmul cannot be fused per q-block.
    # TODO(synk): if the intended semantics is standard MHA (concat heads per
    # token), fuse the fc projection into the attention finalize step instead.
    R = ctxT.reshape(N, n_heads * d_v)

    # ---- 3) fc projection: tiled matmul out = R @ W_fc^T --------------------
    TC = _pick_tile(out_dim)
    out = pl.pallas_call(
        _fc_kernel,
        grid=(N // TR, out_dim // TC),
        in_specs=[
            pl.BlockSpec((TR, n_heads * d_v), lambda r, c: (r, 0)),
            pl.BlockSpec((TC, n_heads * d_v), lambda r, c: (c, 0)),
        ],
        out_specs=pl.BlockSpec((TR, TC), lambda r, c: (r, c)),
        out_shape=jax.ShapeDtypeStruct((N, out_dim), jnp.float32),
        compiler_params=pltpu.CompilerParams(
            dimension_semantics=("parallel", "parallel"),
            vmem_limit_bytes=32 * 1024 * 1024),
    )(R, wfc)
    return out


def _reference(x, w_q, w_k, w_v, w_fc, n_heads):
    """Pure-JAX transcription of the PyTorch forward (for correctness check)."""
    d_k = w_q.shape[0] // n_heads
    d_v = w_v.shape[0] // n_heads
    Q = (x @ w_q.T).reshape(-1, n_heads, d_k).transpose(1, 0, 2)
    K = (x @ w_k.T).reshape(-1, n_heads, d_k).transpose(1, 0, 2)
    V = (x @ w_v.T).reshape(-1, n_heads, d_v).transpose(1, 0, 2)
    s = jnp.matmul(Q, jnp.swapaxes(K, -1, -2)) / jnp.sqrt(jnp.float32(d_k))
    s = jax.nn.softmax(s, axis=-1)
    s = jnp.matmul(s, V)
    s = jnp.swapaxes(s, 1, 2).reshape(-1, n_heads * d_v)
    return s @ w_fc.T


if __name__ == "__main__":
    key = jax.random.PRNGKey(0)
    input_dim, n_heads, seq_len = 32, 4, 512   # seq_len=512 -> 2x2 q/kv tiles of 256
    d_k = d_v = input_dim // n_heads
    out_dim = input_dim                         # module default: ouput_dim=None -> input_dim

    k_x, k_q, k_k, k_v, k_f = jax.random.split(key, 5)
    x = jax.random.normal(k_x, (seq_len, input_dim), jnp.float32)

    def linear_init(k, out_f, in_f):
        # nn.Linear default init: U(-1/sqrt(fan_in), 1/sqrt(fan_in))
        bound = 1.0 / math.sqrt(in_f)
        return jax.random.uniform(k, (out_f, in_f), jnp.float32, -bound, bound)

    w_q = linear_init(k_q, n_heads * d_k, input_dim)
    w_k = linear_init(k_k, n_heads * d_k, input_dim)
    w_v = linear_init(k_v, n_heads * d_v, input_dim)
    w_fc = linear_init(k_f, out_dim, n_heads * d_v)

    ref = _reference(x, w_q, w_k, w_v, w_fc, n_heads)

    # fp32 operands, exact reciprocal -> tight tolerance.
    params32 = prepare_mha_params(w_q, w_k, w_v, w_fc, n_heads, jnp.float32)
    out32 = jax.block_until_ready(
        multi_head_attention(x, *params32, approx_recip=False))
    assert out32.shape == (seq_len, out_dim), out32.shape
    assert jnp.allclose(out32, ref, atol=1e-4, rtol=1e-4), \
        float(jnp.max(jnp.abs(out32 - ref)))

    # bf16 operands (MXU-friendly on v6e/v7x), f32 accumulation + f32 softmax stats.
    params16 = prepare_mha_params(w_q, w_k, w_v, w_fc, n_heads, jnp.bfloat16)
    out16 = jax.block_until_ready(
        multi_head_attention(x, *params16, approx_recip=True))
    assert jnp.allclose(out16, ref, atol=5e-2, rtol=5e-2), \
        float(jnp.max(jnp.abs(out16 - ref)))

    print("KERNEL_OK")
</pallas_src>

<mosaic_0001>
module attributes {stable_mosaic.version = 11 : i64} {
  func.func @_flash_attn_kernel(%arg0: i32, %arg1: i32, %arg2: i32, %arg3: memref<1x8x256xf32, #tpu.memory_space<vmem>>, %arg4: memref<1x256x8xf32, #tpu.memory_space<vmem>>, %arg5: memref<1x8x256xf32, #tpu.memory_space<vmem>>, %arg6: memref<1x8x256xf32, #tpu.memory_space<vmem>>, %arg7: memref<1x256xf32, #tpu.memory_space<vmem>>, %arg8: memref<1x256xf32, #tpu.memory_space<vmem>>, %arg9: memref<8x256xf32, #tpu.memory_space<vmem>>) attributes {dimension_semantics = [#tpu.dimension_semantics<parallel>, #tpu.dimension_semantics<parallel>, #tpu.dimension_semantics<arbitrary>], iteration_bounds = array<i64: 4, 2, 2>, scalar_prefetch = 0 : i64, scratch_operands = 3 : i64, tpu.core_type = #tpu.core_type<tc>, window_params = [{transform_indices = @transform_0, window_bounds = array<i64: 1, 8, 256>}, {transform_indices = @transform_1, window_bounds = array<i64: 1, 256, 8>}, {transform_indices = @transform_2, window_bounds = array<i64: 1, 8, 256>}, {transform_indices = @transform_3, window_bounds = array<i64: 1, 8, 256>}]} {
    %c0_i32 = arith.constant 0 : i32
    %0 = arith.cmpi eq, %arg2, %c0_i32 : i32
    %1 = arith.extui %0 : i1 to i32
    %c0_i32_0 = arith.constant 0 : i32
    %2 = arith.cmpi ne, %1, %c0_i32_0 : i32
    scf.if %2 {
      %cst_25 = arith.constant 0xFF800000 : f32
      %35 = vector.broadcast %cst_25 : f32 to vector<1x256xf32>
      %c0_26 = arith.constant 0 : index
      %c0_27 = arith.constant 0 : index
      %36 = vector.load %arg7[%c0_26, %c0_27] : memref<1x256xf32, #tpu.memory_space<vmem>>, vector<1x256xf32>
      tpu.vector_store %arg7[%c0_26, %c0_27], %35 {strides = array<i32>} : memref<1x256xf32, #tpu.memory_space<vmem>>, vector<1x256xf32>,
      %cst_28 = arith.constant 0.000000e+00 : f32
      %37 = vector.broadcast %cst_28 : f32 to vector<1x256xf32>
      %c0_29 = arith.constant 0 : index
      %c0_30 = arith.constant 0 : index
      %38 = vector.load %arg8[%c0_29, %c0_30] : memref<1x256xf32, #tpu.memory_space<vmem>>, vector<1x256xf32>
      tpu.vector_store %arg8[%c0_29, %c0_30], %37 {strides = array<i32>} : memref<1x256xf32, #tpu.memory_space<vmem>>, vector<1x256xf32>,
      %cst_31 = arith.constant 0.000000e+00 : f32
      %39 = vector.broadcast %cst_31 : f32 to vector<8x256xf32>
      %c0_32 = arith.constant 0 : index
      %c0_33 = arith.constant 0 : index
      %40 = vector.load %arg9[%c0_32, %c0_33] : memref<8x256xf32, #tpu.memory_space<vmem>>, vector<8x256xf32>
      tpu.vector_store %arg9[%c0_32, %c0_33], %39 {strides = array<i32>} : memref<8x256xf32, #tpu.memory_space<vmem>>, vector<8x256xf32>,
    } else {
    }
    %c0 = arith.constant 0 : index
    %c0_1 = arith.constant 0 : index
    %c0_2 = arith.constant 0 : index
    %3 = vector.load %arg4[%c0, %c0_1, %c0_2] : memref<1x256x8xf32, #tpu.memory_space<vmem>>, vector<1x256x8xf32>
    %4 = vector.shape_cast %3 : vector<1x256x8xf32> to vector<256x8xf32>
    %c0_3 = arith.constant 0 : index
    %c0_4 = arith.constant 0 : index
    %c0_5 = arith.constant 0 : index
    %5 = vector.load %arg3[%c0_3, %c0_4, %c0_5] : memref<1x8x256xf32, #tpu.memory_space<vmem>>, vector<1x8x256xf32>
    %6 = vector.shape_cast %5 : vector<1x8x256xf32> to vector<8x256xf32>
    %cst = arith.constant dense<0.000000e+00> : vector<256x256xf32>
    %7 = tpu.matmul %4, %6, %cst {dimension_numbers = #tpu.dot_dimension_numbers<[1], [0], [0], [1], [0, 0, 1, 1], [], []>} : vector<256x8xf32>, vector<8x256xf32>, vector<256x256xf32> -> vector<256x256xf32>
    %c0_6 = arith.constant 0 : index
    %c0_7 = arith.constant 0 : index
    %8 = vector.load %arg7[%c0_6, %c0_7] : memref<1x256xf32, #tpu.memory_space<vmem>>, vector<1x256xf32>
    %cst_8 = arith.constant dense<0xFF800000> : vector<256xf32>
    %9 = vector.multi_reduction <maximumf>, %7, %cst_8 [0] : vector<256x256xf32> to vector<256xf32>
    %10 = vector.shape_cast %9 : vector<256xf32> to vector<1x256xf32>
    %11 = arith.maximumf %8, %10 : vector<1x256xf32>
    %12 = arith.subf %8, %11 : vector<1x256xf32>
    %13 = math.exp %12 : vector<1x256xf32>
    %14 = vector.broadcast %11 : vector<1x256xf32> to vector<256x256xf32>
    %15 = arith.subf %7, %14 : vector<256x256xf32>
    %16 = math.exp %15 : vector<256x256xf32>
    %c0_9 = arith.constant 0 : index
    %c0_10 = arith.constant 0 : index
    %17 = vector.load %arg8[%c0_9, %c0_10] : memref<1x256xf32, #tpu.memory_space<vmem>>, vector<1x256xf32>
    %18 = arith.mulf %13, %17 : vector<1x256xf32>
    %cst_11 = arith.constant dense<0.000000e+00> : vector<256xf32>
    %19 = vector.multi_reduction <add>, %16, %cst_11 [0] : vector<256x256xf32> to vector<256xf32>
    %20 = vector.shape_cast %19 : vector<256xf32> to vector<1x256xf32>
    %21 = arith.addf %18, %20 : vector<1x256xf32>
    %c0_12 = arith.constant 0 : index
    %c0_13 = arith.constant 0 : index
    %22 = vector.load %arg8[%c0_12, %c0_13] : memref<1x256xf32, #tpu.memory_space<vmem>>, vector<1x256xf32>
    tpu.vector_store %arg8[%c0_12, %c0_13], %21 {strides = array<i32>} : memref<1x256xf32, #tpu.memory_space<vmem>>, vector<1x256xf32>,
    %c0_14 = arith.constant 0 : index
    %c0_15 = arith.constant 0 : index
    %23 = vector.load %arg9[%c0_14, %c0_15] : memref<8x256xf32, #tpu.memory_space<vmem>>, vector<8x256xf32>
    %24 = vector.broadcast %13 : vector<1x256xf32> to vector<8x256xf32>
    %25 = arith.mulf %24, %23 : vector<8x256xf32>
    %c0_16 = arith.constant 0 : index
    %c0_17 = arith.constant 0 : index
    %c0_18 = arith.constant 0 : index
    %26 = vector.load %arg5[%c0_16, %c0_17, %c0_18] : memref<1x8x256xf32, #tpu.memory_space<vmem>>, vector<1x8x256xf32>
    %27 = vector.shape_cast %26 : vector<1x8x256xf32> to vector<8x256xf32>
    %cst_19 = arith.constant dense<0.000000e+00> : vector<8x256xf32>
    %28 = tpu.matmul %27, %16, %cst_19 {dimension_numbers = #tpu.dot_dimension_numbers<[1], [0], [0], [1], [0, 0, 1, 1], [], []>} : vector<8x256xf32>, vector<256x256xf32>, vector<8x256xf32> -> vector<8x256xf32>
    %29 = arith.addf %25, %28 : vector<8x256xf32>
    %c0_20 = arith.constant 0 : index
    %c0_21 = arith.constant 0 : index
    %30 = vector.load %arg9[%c0_20, %c0_21] : memref<8x256xf32, #tpu.memory_space<vmem>>, vector<8x256xf32>
    tpu.vector_store %arg9[%c0_20, %c0_21], %29 {strides = array<i32>} : memref<8x256xf32, #tpu.memory_space<vmem>>, vector<8x256xf32>,
    %c0_22 = arith.constant 0 : index
    %c0_23 = arith.constant 0 : index
    %31 = vector.load %arg7[%c0_22, %c0_23] : memref<1x256xf32, #tpu.memory_space<vmem>>, vector<1x256xf32>
    tpu.vector_store %arg7[%c0_22, %c0_23], %11 {strides = array<i32>} : memref<1x256xf32, #tpu.memory_space<vmem>>, vector<1x256xf32>,
    %c1_i32 = arith.constant 1 : i32
    %32 = arith.cmpi eq, %arg2, %c1_i32 : i32
    %33 = arith.extui %32 : i1 to i32
    %c0_i32_24 = arith.constant 0 : i32
    %34 = arith.cmpi ne, %33, %c0_i32_24 : i32
    scf.if %34 {
      %c0_25 = arith.constant 0 : index
      %c0_26 = arith.constant 0 : index
      %35 = vector.load %arg8[%c0_25, %c0_26] : memref<1x256xf32, #tpu.memory_space<vmem>>, vector<1x256xf32>
      %36 = tpu.reciprocal %35 : vector<1x256xf32> -> vector<1x256xf32>
      %c0_27 = arith.constant 0 : index
      %c0_28 = arith.constant 0 : index
      %37 = vector.load %arg9[%c0_27, %c0_28] : memref<8x256xf32, #tpu.memory_space<vmem>>, vector<8x256xf32>
      %38 = vector.broadcast %36 : vector<1x256xf32> to vector<8x256xf32>
      %39 = arith.mulf %37, %38 : vector<8x256xf32>
      %c0_29 = arith.constant 0 : index
      %c0_30 = arith.constant 0 : index
      %c0_31 = arith.constant 0 : index
      %40 = vector.load %arg6[%c0_29, %c0_30, %c0_31] : memref<1x8x256xf32, #tpu.memory_space<vmem>>, vector<1x8x256xf32>
      %41 = vector.shape_cast %40 : vector<1x8x256xf32> to vector<8x256xf32>
      %42 = vector.shape_cast %39 : vector<8x256xf32> to vector<1x8x256xf32>
      tpu.vector_store %arg6[%c0_29, %c0_30, %c0_31], %42 {strides = array<i32>} : memref<1x8x256xf32, #tpu.memory_space<vmem>>, vector<1x8x256xf32>,
    } else {
    }
    return
  }
  func.func @transform_0(%arg0: i32, %arg1: i32, %arg2: i32) -> (i32, i32, i32) {
    %c0_i32 = arith.constant 0 : i32
    %c0_i32_0 = arith.constant 0 : i32
    return %arg0, %c0_i32, %arg1 : i32, i32, i32
  }
  func.func @transform_1(%arg0: i32, %arg1: i32, %arg2: i32) -> (i32, i32, i32) {
    %c0_i32 = arith.constant 0 : i32
    %c0_i32_0 = arith.constant 0 : i32
    return %arg0, %arg2, %c0_i32 : i32, i32, i32
  }
  func.func @transform_2(%arg0: i32, %arg1: i32, %arg2: i32) -> (i32, i32, i32) {
    %c0_i32 = arith.constant 0 : i32
    %c0_i32_0 = arith.constant 0 : i32
    return %arg0, %c0_i32, %arg2 : i32, i32, i32
  }
  func.func @transform_3(%arg0: i32, %arg1: i32, %arg2: i32) -> (i32, i32, i32) {
    %c0_i32 = arith.constant 0 : i32
    %c0_i32_0 = arith.constant 0 : i32
    return %arg0, %c0_i32, %arg1 : i32, i32, i32
  }
}

module attributes {stable_mosaic.version = 11 : i64} {
  func.func @_qkv_proj_kernel(%arg0: i32, %arg1: i32, %arg2: memref<256x32xf32, #tpu.memory_space<vmem>>, %arg3: memref<1x8x32xf32, #tpu.memory_space<vmem>>, %arg4: memref<1x8x32xf32, #tpu.memory_space<vmem>>, %arg5: memref<1x8x32xf32, #tpu.memory_space<vmem>>, %arg6: memref<1x8x256xf32, #tpu.memory_space<vmem>>, %arg7: memref<1x256x8xf32, #tpu.memory_space<vmem>>, %arg8: memref<1x8x256xf32, #tpu.memory_space<vmem>>) attributes {dimension_semantics = [#tpu.dimension_semantics<parallel>, #tpu.dimension_semantics<parallel>], iteration_bounds = array<i64: 4, 2>, scalar_prefetch = 0 : i64, scratch_operands = 0 : i64, tpu.core_type = #tpu.core_type<tc>, window_params = [{transform_indices = @transform_0, window_bounds = array<i64: 256, 32>}, {transform_indices = @transform_1, window_bounds = array<i64: 1, 8, 32>}, {transform_indices = @transform_2, window_bounds = array<i64: 1, 8, 32>}, {transform_indices = @transform_3, window_bounds = array<i64: 1, 8, 32>}, {transform_indices = @transform_4, window_bounds = array<i64: 1, 8, 256>}, {transform_indices = @transform_5, window_bounds = array<i64: 1, 256, 8>}, {transform_indices = @transform_6, window_bounds = array<i64: 1, 8, 256>}]} {
    %c0 = arith.constant 0 : index
    %c0_0 = arith.constant 0 : index
    %0 = vector.load %arg2[%c0, %c0_0] : memref<256x32xf32, #tpu.memory_space<vmem>>, vector<256x32xf32>
    %c0_1 = arith.constant 0 : index
    %c0_2 = arith.constant 0 : index
    %c0_3 = arith.constant 0 : index
    %1 = vector.load %arg3[%c0_1, %c0_2, %c0_3] : memref<1x8x32xf32, #tpu.memory_space<vmem>>, vector<1x8x32xf32>
    %2 = vector.shape_cast %1 : vector<1x8x32xf32> to vector<8x32xf32>
    %cst = arith.constant dense<0.000000e+00> : vector<8x256xf32>
    %3 = tpu.matmul %2, %0, %cst {dimension_numbers = #tpu.dot_dimension_numbers<[1], [1], [0], [0], [0, 0, 1, 0], [], []>} : vector<8x32xf32>, vector<256x32xf32>, vector<8x256xf32> -> vector<8x256xf32>
    %c0_4 = arith.constant 0 : index
    %c0_5 = arith.constant 0 : index
    %c0_6 = arith.constant 0 : index
    %4 = vector.load %arg6[%c0_4, %c0_5, %c0_6] : memref<1x8x256xf32, #tpu.memory_space<vmem>>, vector<1x8x256xf32>
    %5 = vector.shape_cast %4 : vector<1x8x256xf32> to vector<8x256xf32>
    %6 = vector.shape_cast %3 : vector<8x256xf32> to vector<1x8x256xf32>
    tpu.vector_store %arg6[%c0_4, %c0_5, %c0_6], %6 {strides = array<i32>} : memref<1x8x256xf32, #tpu.memory_space<vmem>>, vector<1x8x256xf32>,
    %c0_7 = arith.constant 0 : index
    %c0_8 = arith.constant 0 : index
    %c0_9 = arith.constant 0 : index
    %7 = vector.load %arg4[%c0_7, %c0_8, %c0_9] : memref<1x8x32xf32, #tpu.memory_space<vmem>>, vector<1x8x32xf32>
    %8 = vector.shape_cast %7 : vector<1x8x32xf32> to vector<8x32xf32>
    %cst_10 = arith.constant dense<0.000000e+00> : vector<256x8xf32>
    %9 = tpu.matmul %0, %8, %cst_10 {dimension_numbers = #tpu.dot_dimension_numbers<[1], [1], [0], [0], [0, 0, 1, 0], [], []>} : vector<256x32xf32>, vector<8x32xf32>, vector<256x8xf32> -> vector<256x8xf32>
    %c0_11 = arith.constant 0 : index
    %c0_12 = arith.constant 0 : index
    %c0_13 = arith.constant 0 : index
    %10 = vector.load %arg7[%c0_11, %c0_12, %c0_13] : memref<1x256x8xf32, #tpu.memory_space<vmem>>, vector<1x256x8xf32>
    %11 = vector.shape_cast %10 : vector<1x256x8xf32> to vector<256x8xf32>
    %12 = vector.shape_cast %9 : vector<256x8xf32> to vector<1x256x8xf32>
    tpu.vector_store %arg7[%c0_11, %c0_12, %c0_13], %12 {strides = array<i32>} : memref<1x256x8xf32, #tpu.memory_space<vmem>>, vector<1x256x8xf32>,
    %c0_14 = arith.constant 0 : index
    %c0_15 = arith.constant 0 : index
    %c0_16 = arith.constant 0 : index
    %13 = vector.load %arg5[%c0_14, %c0_15, %c0_16] : memref<1x8x32xf32, #tpu.memory_space<vmem>>, vector<1x8x32xf32>
    %14 = vector.shape_cast %13 : vector<1x8x32xf32> to vector<8x32xf32>
    %cst_17 = arith.constant dense<0.000000e+00> : vector<8x256xf32>
    %15 = tpu.matmul %14, %0, %cst_17 {dimension_numbers = #tpu.dot_dimension_numbers<[1], [1], [0], [0], [0, 0, 1, 0], [], []>} : vector<8x32xf32>, vector<256x32xf32>, vector<8x256xf32> -> vector<8x256xf32>
    %c0_18 = arith.constant 0 : index
    %c0_19 = arith.constant 0 : index
    %c0_20 = arith.constant 0 : index
    %16 = vector.load %arg8[%c0_18, %c0_19, %c0_20] : memref<1x8x256xf32, #tpu.memory_space<vmem>>, vector<1x8x256xf32>
    %17 = vector.shape_cast %16 : vector<1x8x256xf32> to vector<8x256xf32>
    %18 = vector.shape_cast %15 : vector<8x256xf32> to vector<1x8x256xf32>
    tpu.vector_store %arg8[%c0_18, %c0_19, %c0_20], %18 {strides = array<i32>} : memref<1x8x256xf32, #tpu.memory_space<vmem>>, vector<1x8x256xf32>,
    return
  }
  func.func @transform_0(%arg0: i32, %arg1: i32) -> (i32, i32) {
    %c0_i32 = arith.constant 0 : i32
    %c0_i32_0 = arith.constant 0 : i32
    return %arg1, %c0_i32 : i32, i32
  }
  func.func @transform_1(%arg0: i32, %arg1: i32) -> (i32, i32, i32) {
    %c0_i32 = arith.constant 0 : i32
    %c0_i32_0 = arith.constant 0 : i32
    %c0_i32_1 = arith.constant 0 : i32
    return %arg0, %c0_i32, %c0_i32_0 : i32, i32, i32
  }
  func.func @transform_2(%arg0: i32, %arg1: i32) -> (i32, i32, i32) {
    %c0_i32 = arith.constant 0 : i32
    %c0_i32_0 = arith.constant 0 : i32
    %c0_i32_1 = arith.constant 0 : i32
    return %arg0, %c0_i32, %c0_i32_0 : i32, i32, i32
  }
  func.func @transform_3(%arg0: i32, %arg1: i32) -> (i32, i32, i32) {
    %c0_i32 = arith.constant 0 : i32
    %c0_i32_0 = arith.constant 0 : i32
    %c0_i32_1 = arith.constant 0 : i32
    return %arg0, %c0_i32, %c0_i32_0 : i32, i32, i32
  }
  func.func @transform_4(%arg0: i32, %arg1: i32) -> (i32, i32, i32) {
    %c0_i32 = arith.constant 0 : i32
    %c0_i32_0 = arith.constant 0 : i32
    return %arg0, %c0_i32, %arg1 : i32, i32, i32
  }
  func.func @transform_5(%arg0: i32, %arg1: i32) -> (i32, i32, i32) {
    %c0_i32 = arith.constant 0 : i32
    %c0_i32_0 = arith.constant 0 : i32
    return %arg0, %arg1, %c0_i32 : i32, i32, i32
  }
  func.func @transform_6(%arg0: i32, %arg1: i32) -> (i32, i32, i32) {
    %c0_i32 = arith.constant 0 : i32
    %c0_i32_0 = arith.constant 0 : i32
    return %arg0, %c0_i32, %arg1 : i32, i32, i32
  }
}

module attributes {stable_mosaic.version = 11 : i64} {
  func.func @_fc_kernel(%arg0: i32, %arg1: i32, %arg2: memref<256x32xf32, #tpu.memory_space<vmem>>, %arg3: memref<32x32xf32, #tpu.memory_space<vmem>>, %arg4: memref<256x32xf32, #tpu.memory_space<vmem>>) attributes {dimension_semantics = [#tpu.dimension_semantics<parallel>, #tpu.dimension_semantics<parallel>], iteration_bounds = array<i64: 2, 1>, scalar_prefetch = 0 : i64, scratch_operands = 0 : i64, tpu.core_type = #tpu.core_type<tc>, window_params = [{transform_indices = @transform_0, window_bounds = array<i64: 256, 32>}, {transform_indices = @transform_1, window_bounds = array<i64: 32, 32>}, {transform_indices = @transform_2, window_bounds = array<i64: 256, 32>}]} {
    %c0 = arith.constant 0 : index
    %c0_0 = arith.constant 0 : index
    %0 = vector.load %arg2[%c0, %c0_0] : memref<256x32xf32, #tpu.memory_space<vmem>>, vector<256x32xf32>
    %c0_1 = arith.constant 0 : index
    %c0_2 = arith.constant 0 : index
    %1 = vector.load %arg3[%c0_1, %c0_2] : memref<32x32xf32, #tpu.memory_space<vmem>>, vector<32x32xf32>
    %cst = arith.constant dense<0.000000e+00> : vector<256x32xf32>
    %2 = tpu.matmul %0, %1, %cst {dimension_numbers = #tpu.dot_dimension_numbers<[1], [1], [0], [0], [0, 0, 1, 0], [], []>} : vector<256x32xf32>, vector<32x32xf32>, vector<256x32xf32> -> vector<256x32xf32>
    %c0_3 = arith.constant 0 : index
    %c0_4 = arith.constant 0 : index
    %3 = vector.load %arg4[%c0_3, %c0_4] : memref<256x32xf32, #tpu.memory_space<vmem>>, vector<256x32xf32>
    tpu.vector_store %arg4[%c0_3, %c0_4], %2 {strides = array<i32>} : memref<256x32xf32, #tpu.memory_space<vmem>>, vector<256x32xf32>,
    return
  }
  func.func @transform_0(%arg0: i32, %arg1: i32) -> (i32, i32) {
    %c0_i32 = arith.constant 0 : i32
    %c0_i32_0 = arith.constant 0 : i32
    return %arg0, %c0_i32 : i32, i32
  }
  func.func @transform_1(%arg0: i32, %arg1: i32) -> (i32, i32) {
    %c0_i32 = arith.constant 0 : i32
    %c0_i32_0 = arith.constant 0 : i32
    return %arg1, %c0_i32 : i32, i32
  }
  func.func @transform_2(%arg0: i32, %arg1: i32) -> (i32, i32) {
    %c0_i32 = arith.constant 0 : i32
    return %arg0, %arg1 : i32, i32
  }
}

</mosaic_0001>

<bundles_post_ra>
// kernel: multi_head_attention.3
= control target key start
LH: loop header
LB: loop body
LE: loop exit
PB: predicated region body
PF: predicated region fallthrough
CT: control target
= control target key end

     0   :  { %s1622_s21 = smov 0   ;;  %s1624_s22 = smov 0   ;;  %s1942_s0 = inlined_call_operand.vmem [shape: f32[512,32], index: 0, kind: input, shape index: {}]   ;;  %s1943_s1 = inlined_call_operand.vmem [shape: f32[4,8,32], index: 1, kind: input, shape index: {}]   ;;  %s1944_s2 = inlined_call_operand.vmem [shape: f32[4,8,32], index: 2, kind: input, shape index: {}]   ;;  %s1945_s3 = inlined_call_operand.vmem [shape: f32[4,8,32], index: 3, kind: input, shape index: {}]   ;;  %s1946_s4 = inlined_call_operand.vmem [shape: f32[4,8,512], index: 4, kind: output, shape index: {0}]   ;;  %s1947_s5 = inlined_call_operand.vmem [shape: f32[4,512,8], index: 5, kind: output, shape index: {1}]   ;;  %s1948_s6 = inlined_call_operand.vmem [shape: f32[4,8,512], index: 6, kind: output, shape index: {2}]  }
   0x1   :  { %s1626_s23 = smov 0   ;;  %s1628_s24 = smov 0  }
   0x2   :  { %s1630_s25 = smov 0  }
   0x3 LB: > { %s26_s26 = sadd.s32 1, %s1577_s23  ;;  %s29_s27 = sadd.s32 1, %s1581_s24  ;;  %s1585_s25 = sphi %s1630_s25, %s17_s25   ;;  %s1581_s24 = sphi %s1628_s24, %s1954_s24   ;;  %s1577_s23 = sphi %s1626_s23, %s1953_s23   ;;  %s1573_s22 = sphi %s1624_s22, %s1952_s22   ;;  %s1569_s21 = sphi %s1622_s21, %s1951_s21  }
   0x4   : > { %p27_p0 = scmp.ge.s32.totalorder %s26_s26, 2  ;;  %p1144_p1 = scmp.ge.s32.totalorder %s1585_s25, 1 }
   0x5   : > { %p263_p2 = scmp.lt.s32.totalorder %s1585_s25, 9 }
   0x6   : > { %s1956_s26 = smov (%p27_p0, %s26_s26), 0  ;;  %s1958_s27 = smov (!%p27_p0, %s29_s27), %s1581_s24 }
   0x7   : > { %p264_p3 = pnand %p1144_p1, %p263_p2  ;;  %p31_p4 = scmp.ge.s32.totalorder %s1958_s27, 4 }
   0x8   : > { %s1145_s28 = sshll.u32 (!%p264_p3), %s1569_s21, 5  ;;  %p333_p5 = scmp.lt.s32.totalorder (!%p264_p3), %s1573_s22, 3  ;;  %vm408_vm0 = vcmask (!%p264_p3), 261120   ;;  %vm810_vm2 = vcmask (!%p264_p3), 64512  }
   0x9   : > { %s1960_s27 = smov (%p31_p4, %s1958_s27), 0  ;;  %267 = sbr.rel (%p264_p3) target bundleno = 303 (0x12f), region = 36 }
   0xa   : > { %p328_p6 = scmp.lt.s32.totalorder (!%p264_p3), %s1145_s28, 63  ;;  %vm1685_vm1 = vmpackc.low (!%p264_p3), %vm408_vm0, %vm408_vm0 }
  0x10   : > { %s1962_s22 = smov (!%p333_p5, %s1573_s22), 3  ;;  %s1964_s28 = smov (!%p328_p6, %s1145_s28), 63 }
  0x11   : > { %s1660_s29 = sshll.u32 %s1962_s22, 3  ;;  %s1146_s30 = sshll.u32 %s1964_s28, 3 }
  0x12   : > { %s340_s9 = scalar_lea.vmem %s1944_s2, %s1660_s29  ;;  %s1670_s12 = scalar_lea.vmem %s1942_s0, %s1146_s30 }
  0x13   : > { %v581_v0 = vld [vmem:[%s340_s9] sm:$0xff]  ;;  %v376_v2 = vld [vmem:[%s1670_s12 + $0x8] sm:$0xff]  ;;  %v1692_v8 = vld [vmem:[%s1670_s12 + $0x90] sm:$0xff]  ;;  %s336_s15 = scalar_lea.vmem %s1943_s1, %s1660_s29  ;;  %s344_s18 = scalar_lea.vmem %s1945_s3, %s1660_s29 }
  0x14   : > { %1361 = vmatprep.subr.msk.mxu1 %vm408_vm0, %v581_v0  ;;  %v375_v1 = vld [vmem:[%s1670_s12] sm:$0xff]  ;;  %v1681_v5 = vld [vmem:[%s1670_s12 + $0x88] sm:$0xff]  ;;  %v1695_v9 = vld [vmem:[%s1670_s12 + $0x98] sm:$0xff]  ;;  %s1154_s19 = sshll.u32 %s1962_s22, 6  ;;  %s1151_s9 = sshll.u32 %s1962_s22, 2 }
  0x15   : > { %v1676_v3 = vld [vmem:[%s1670_s12 + $0x80] sm:$0xff]  ;;  %1362 = vmatpush3.xpose.msk.msra.mxu1 %vm408_vm0, %v581_v0  ;;  %v1414_v4 = vpack.c.bf16 %v376_v2, %v375_v1  ;;  %1363 = vmatprep.mubr.msk.f32.mxu1 %vm408_vm0, %v375_v1  ;;  %v377_v10 = vld [vmem:[%s1670_s12 + $0x10] sm:$0xff]  ;;  %v1417_v11 = vpack.c.bf16 %v1695_v9, %v1692_v8  ;;  %v378_v12 = vld [vmem:[%s1670_s12 + $0x18] sm:$0xff]  ;;  %s361_s20 = sadd.s32 %s1154_s19, %s1964_s28  ;;  %s1150_s28 = sshll.u32 %s1569_s21, 1 }
  0x16   : > { %v1411_v7 = vpack.c.bf16 %v1681_v5, %v1676_v3  ;;  %v379_v13 = vld [vmem:[%s1670_s12 + $0x20] sm:$0xff]  ;;  %v1720_v15 = vld [vmem:[%s1670_s12 + $0xa8] sm:$0xff]  ;;  %v1420_v16 = vpack.c.bf16 %v378_v12, %v377_v10  ;;  %v381_v18 = vld [vmem:[%s1670_s12 + $0x30] sm:$0xff]  ;;  %s1155_s29 = sshll.u32 %s361_s20, 3  ;;  %p348_p7 = scmp.lt.s32.totalorder %s1150_s28, 3 }
  0x17   : > { %v1717_v14 = vld [vmem:[%s1670_s12 + $0xa0] sm:$0xff]  ;;  %v380_v17 = vld [vmem:[%s1670_s12 + $0x28] sm:$0xff]  ;;  %v382_v21 = vld [vmem:[%s1670_s12 + $0x38] sm:$0xff]  ;;  %s1853_s8 = scalar_lea.vmem %s1947_s5, %s1155_s29 }
  0x18   : > { %1413 = vmatprep.subr.msk.bf16.mxu0 %vm1685_vm1, %v1411_v7  ;;  %1364 = vmatmul.mubr.msk.f32.vlgmr.msra.gmra.mrb[0].mxu1 %vm408_vm0, %v376_v2  ;;  %v1423_v19 = vpack.c.bf16 %v1720_v15, %v1717_v14  ;;  %v1732_v20 = vld [vmem:[%s336_s15] sm:$0xff]  ;;  %v397_v23 = vld [vmem:[%s1670_s12 + $0xb0] sm:$0xff]  ;;  %v398_v24 = vld [vmem:[%s1670_s12 + $0xb8] sm:$0xff]  ;;  %v1426_v25 = vpack.c.bf16 %v380_v17, %v379_v13  ;;  %v1432_v33 = vpack.c.bf16 %v382_v21, %v381_v18  ;;  %s1966_s28 = smov (!%p348_p7, %s1150_s28), 3 }
  0x19   : > { %1461 = vmatprep.subr.msk.bf16.mxu1 %vm1685_vm1, %v1411_v7  ;;  %1416 = vmatpush3.bf16.xpose.msk.msra.mxu0 %vm1685_vm1, %v1414_v4  ;;  %v383_v22 = vld [vmem:[%s1670_s12 + $0x40] sm:$0xff]  ;;  %v384_v26 = vld [vmem:[%s1670_s12 + $0x48] sm:$0xff]  ;;  %v385_v27 = vld [vmem:[%s1670_s12 + $0x50] sm:$0xff]  ;;  %v1429_v28 = vpack.c.bf16 %v398_v24, %v397_v23  ;;  %s351_s21 = sadd.s32 %s1151_s9, %s1966_s28 }
  0x1a   : > { %1464 = vmatpush3.bf16.xpose.msk.msra.mxu1 %vm1685_vm1, %v1414_v4  ;;  %1366 = vmatprep.mubr.msk.f32.mxu1 %vm408_vm0, %v377_v10  ;;  %v386_v29 = vld [vmem:[%s1670_s12 + $0x58] sm:$0xff]  ;;  %v387_v30 = vld [vmem:[%s1670_s12 + $0x60] sm:$0xff]  ;;  %v400_v32 = vld [vmem:[%s1670_s12 + $0xc8] sm:$0xff]  ;;  %v1438_v40 = vpack.c.bf16 %v384_v26, %v383_v22  ;;  %s1152_s10 = sshll.u32 %s351_s21, 3 }
  0x1b   : > { %1419 = vmatprep.subr.msk.bf16.mxu0 %vm1685_vm1, %v1417_v11  ;;  %1467 = vmatprep.subr.msk.bf16.mxu1 %vm1685_vm1, %v1417_v11  ;;  %v399_v31 = vld [vmem:[%s1670_s12 + $0xc0] sm:$0xff]  ;;  %v388_v34 = vld [vmem:[%s1670_s12 + $0x68] sm:$0xff]  ;;  %v389_v35 = vld [vmem:[%s1670_s12 + $0x70] sm:$0xff]  ;;  %v1444_v44 = vpack.c.bf16 %v386_v29, %v385_v27  ;;  %s353_s22 = scalar_lea.vmem %s1946_s4, %s1152_s10  ;;  %s373_s15 = scalar_lea.vmem %s1948_s6, %s1152_s10 }
  0x1c   : > { %1367 = vmatmul.mubr.msk.f32.gmra.mrb[2].mxu1 %vm408_vm0, %v378_v12  ;;  %1292 = vmatprep.mubr.msk.f32.mxu0 %vm408_vm0, %v1732_v20  ;;  %v1435_v36 = vpack.c.bf16 %v400_v32, %v399_v31  ;;  %v390_v37 = vld [vmem:[%s1670_s12 + $0x78] sm:$0xff]  ;;  %v401_v38 = vld [vmem:[%s1670_s12 + $0xd0] sm:$0xff]  ;;  %v403_v42 = vld [vmem:[%s1670_s12 + $0xe0] sm:$0xff]  ;;  %v1450_v48 = vpack.c.bf16 %v388_v34, %v387_v30 }
  0x1d   : > { %1369 = vmatprep.mubr.msk.f32.mxu1 %vm408_vm0, %v379_v13  ;;  %v402_v39 = vld [vmem:[%s1670_s12 + $0xd8] sm:$0xff]  ;;  %v404_v43 = vld [vmem:[%s1670_s12 + $0xe8] sm:$0xff]  ;;  %v405_v46 = vld [vmem:[%s1670_s12 + $0xf0] sm:$0xff]  ;;  %v1456_v50 = vpack.c.bf16 %v390_v37, %v389_v35 }
  0x1e   : > { %v1441_v41 = vpack.c.bf16 %v402_v39, %v401_v38  ;;  %v1447_v45 = vpack.c.bf16 %v404_v43, %v403_v42  ;;  %v406_v47 = vld [vmem:[%s1670_s12 + $0xf8] sm:$0xff]  ;;  %v843_v51 = vld [vmem:[%s344_s18] sm:$0xff] }
  0x1f   : > { %v1453_v49 = vpack.c.bf16 %v406_v47, %v405_v46 }
  0x20   : > { %1370 = vmatmul.mubr.msk.f32.gmra.mrb[4].mxu1 %vm408_vm0, %v380_v17 }
  0x21   : > { %1422 = vmatpush3.bf16.xpose.msk.msra.mxu0 %vm1685_vm1, %v1420_v16  ;;  %1372 = vmatprep.mubr.msk.f32.mxu1 %vm408_vm0, %v381_v18 }
  0x22   : > { %1470 = vmatpush3.bf16.xpose.msk.msra.mxu1 %vm1685_vm1, %v1420_v16  ;;  %1425 = vmatprep.subr.msk.bf16.mxu0 %vm1685_vm1, %v1423_v19 }
  0x23   : > { %1473 = vmatprep.subr.msk.bf16.mxu1 %vm1685_vm1, %v1423_v19 }
  0x24   : > { %1373 = vmatmul.mubr.msk.f32.gmra.mrb[6].mxu1 %vm408_vm0, %v382_v21 }
  0x25   : > { %1375 = vmatprep.mubr.msk.f32.mxu1 %vm408_vm0, %v383_v22 }
  0x28   : > { %1376 = vmatmul.mubr.msk.f32.gmra.mrb[8].mxu1 %vm408_vm0, %v384_v26 }
  0x29   : > { %1428 = vmatpush3.bf16.xpose.msk.msra.mxu0 %vm1685_vm1, %v1426_v25  ;;  %1378 = vmatprep.mubr.msk.f32.mxu1 %vm408_vm0, %v385_v27 }
  0x2a   : > { %1476 = vmatpush3.bf16.xpose.msk.msra.mxu1 %vm1685_vm1, %v1426_v25  ;;  %1431 = vmatprep.subr.msk.bf16.mxu0 %vm1685_vm1, %v1429_v28 }
  0x2b   : > { %1479 = vmatprep.subr.msk.bf16.mxu1 %vm1685_vm1, %v1429_v28 }
  0x2c   : > { %1379 = vmatmul.mubr.msk.f32.gmra.mrb[10].mxu1 %vm408_vm0, %v386_v29 }
  0x2d   : > { %1381 = vmatprep.mubr.msk.f32.mxu1 %vm408_vm0, %v387_v30 }
  0x30   : > { %1382 = vmatmul.mubr.msk.f32.gmra.mrb[12].mxu1 %vm408_vm0, %v388_v34 }
  0x31   : > { %1434 = vmatpush3.bf16.xpose.msk.msra.mxu0 %vm1685_vm1, %v1432_v33  ;;  %1384 = vmatprep.mubr.msk.f32.mxu1 %vm408_vm0, %v389_v35 }
  0x32   : > { %1482 = vmatpush3.bf16.xpose.msk.msra.mxu1 %vm1685_vm1, %v1432_v33  ;;  %1437 = vmatprep.subr.msk.bf16.mxu0 %vm1685_vm1, %v1435_v36 }
  0x33   : > { %1485 = vmatprep.subr.msk.bf16.mxu1 %vm1685_vm1, %v1435_v36 }
  0x34   : > { %1385 = vmatmul.mubr.msk.f32.gmra.mrb[14].mxu1 %vm408_vm0, %v390_v37 }
  0x35   : > { %1387 = vmatprep.mubr.msk.f32.mxu1 %vm408_vm0, %v1676_v3 }
  0x38   : > { %1388 = vmatmul.mubr.msk.f32.gmra.mrb[16].mxu1 %vm408_vm0, %v1681_v5 }
  0x39   : > { %1440 = vmatpush3.bf16.xpose.msk.msra.mxu0 %vm1685_vm1, %v1438_v40  ;;  %1390 = vmatprep.mubr.msk.f32.mxu1 %vm408_vm0, %v1692_v8 }
  0x3a   : > { %1488 = vmatpush3.bf16.xpose.msk.msra.mxu1 %vm1685_vm1, %v1438_v40  ;;  %1443 = vmatprep.subr.msk.bf16.mxu0 %vm1685_vm1, %v1441_v41 }
  0x3b   : > { %1491 = vmatprep.subr.msk.bf16.mxu1 %vm1685_vm1, %v1441_v41 }
  0x3c   : > { %1391 = vmatmul.mubr.msk.f32.gmra.mrb[18].mxu1 %vm408_vm0, %v1695_v9 }
  0x3d   : > { %1393 = vmatprep.mubr.msk.f32.mxu1 %vm408_vm0, %v1717_v14 }
  0x40   : > { %1394 = vmatmul.mubr.msk.f32.gmra.mrb[20].mxu1 %vm408_vm0, %v1720_v15 }
  0x41   : > { %1446 = vmatpush3.bf16.xpose.msk.msra.mxu0 %vm1685_vm1, %v1444_v44  ;;  %1396 = vmatprep.mubr.msk.f32.mxu1 %vm408_vm0, %v397_v23 }
  0x42   : > { %1494 = vmatpush3.bf16.xpose.msk.msra.mxu1 %vm1685_vm1, %v1444_v44  ;;  %1449 = vmatprep.subr.msk.bf16.mxu0 %vm1685_vm1, %v1447_v45 }
  0x43   : > { %1497 = vmatprep.subr.msk.bf16.mxu1 %vm1685_vm1, %v1447_v45 }
  0x44   : > { %1397 = vmatmul.mubr.msk.f32.gmra.mrb[22].mxu1 %vm408_vm0, %v398_v24 }
  0x45   : > { %1399 = vmatprep.mubr.msk.f32.mxu1 %vm408_vm0, %v399_v31 }
  0x48   : > { %1400 = vmatmul.mubr.msk.f32.gmra.mrb[24].mxu1 %vm408_vm0, %v400_v32 }
  0x49   : > { %1452 = vmatpush3.bf16.xpose.msk.msra.mxu0 %vm1685_vm1, %v1450_v48  ;;  %1402 = vmatprep.mubr.msk.f32.mxu1 %vm408_vm0, %v401_v38 }
  0x4a   : > { %1500 = vmatpush3.bf16.xpose.msk.msra.mxu1 %vm1685_vm1, %v1450_v48  ;;  %1455 = vmatprep.subr.msk.bf16.mxu0 %vm1685_vm1, %v1453_v49 }
  0x4b   : > { %1503 = vmatprep.subr.msk.bf16.mxu1 %vm1685_vm1, %v1453_v49 }
  0x4c   : > { %1403 = vmatmul.mubr.msk.f32.gmra.mrb[26].mxu1 %vm408_vm0, %v402_v39 }
  0x4d   : > { %1405 = vmatprep.mubr.msk.f32.mxu1 %vm408_vm0, %v403_v42 }
  0x50   : > { %1406 = vmatmul.mubr.msk.f32.gmra.mrb[28].mxu1 %vm408_vm0, %v404_v43 }
  0x51   : > { %1458 = vmatpush3.bf16.xpose.msk.msra.mxu0 %vm1685_vm1, %v1456_v50  ;;  %1408 = vmatprep.mubr.msk.f32.mxu1 %vm408_vm0, %v405_v46 }
  0x52   : > { %1506 = vmatpush3.bf16.xpose.msk.msra.mxu1 %vm1685_vm1, %v1456_v50 }
  0x54   : > { %1409 = vmatmul.mubr.msk.f32.gmra.mrb[30].mxu1 %vm408_vm0, %v406_v47 }
  0x55   : > { %1359 = vmatprep.mubr.msk.f32.mxu1 %vm408_vm0, %v843_v51 }
  0x58   : > { %1293 = vmatmul.mubr.msk.f32.vlgmr.msra.gmra.mrb[0].mxu0 %vm408_vm0, %v1732_v20 }
  0x59   : > { %1360 = vmatmul.mubr.msk.f32.vlgmr.msra.gmra.mrb[32].mxu1 %vm408_vm0, %v843_v51 }
  0xeb   : > { %v1365_v52 = vpop.f32.mrb[0].mxu1 }
  0xec   : > { %812 = vst.msk [vmem:[%s1853_s8 + $0x8] sm:$0xff] %vm810_vm2, %v1365_v52  ;;  %v651_v53 = vpop.f32.mrb[1].mxu1 }
  0xed   : > { %811 = vst.msk [vmem:[%s1853_s8] sm:$0xff] %vm810_vm2, %v651_v53 }
  0xef   : > { %v1368_v54 = vpop.f32.mrb[2].mxu1 }
  0xf0   : > { %814 = vst.msk [vmem:[%s1853_s8 + $0x18] sm:$0xff] %vm810_vm2, %v1368_v54  ;;  %v661_v55 = vpop.f32.mrb[3].mxu1 }
  0xf1   : > { %813 = vst.msk [vmem:[%s1853_s8 + $0x10] sm:$0xff] %vm810_vm2, %v661_v55 }
  0xf3   : > { %v1371_v56 = vpop.f32.mrb[4].mxu1 }
  0xf4   : > { %816 = vst.msk [vmem:[%s1853_s8 + $0x28] sm:$0xff] %vm810_vm2, %v1371_v56  ;;  %v671_v57 = vpop.f32.mrb[5].mxu1 }
  0xf5   : > { %815 = vst.msk [vmem:[%s1853_s8 + $0x20] sm:$0xff] %vm810_vm2, %v671_v57 }
  0xf7   : > { %v1374_v58 = vpop.f32.mrb[6].mxu1 }
  0xf8   : > { %818 = vst.msk [vmem:[%s1853_s8 + $0x38] sm:$0xff] %vm810_vm2, %v1374_v58  ;;  %v681_v59 = vpop.f32.mrb[7].mxu1 }
  0xf9   : > { %817 = vst.msk [vmem:[%s1853_s8 + $0x30] sm:$0xff] %vm810_vm2, %v681_v59 }
  0xfb   : > { %v1377_v60 = vpop.f32.mrb[8].mxu1 }
  0xfc   : > { %820 = vst.msk [vmem:[%s1853_s8 + $0x48] sm:$0xff] %vm810_vm2, %v1377_v60  ;;  %v691_v61 = vpop.f32.mrb[9].mxu1 }
  0xfd   : > { %819 = vst.msk [vmem:[%s1853_s8 + $0x40] sm:$0xff] %vm810_vm2, %v691_v61 }
  0xff   : > { %v1380_v62 = vpop.f32.mrb[10].mxu1 }
 0x100   : > { %822 = vst.msk [vmem:[%s1853_s8 + $0x58] sm:$0xff] %vm810_vm2, %v1380_v62  ;;  %v701_v63 = vpop.f32.mrb[11].mxu1 }
 0x101   : > { %821 = vst.msk [vmem:[%s1853_s8 + $0x50] sm:$0xff] %vm810_vm2, %v701_v63 }
 0x103   : > { %v1383_v0 = vpop.f32.mrb[12].mxu1 }
 0x104   : > { %824 = vst.msk [vmem:[%s1853_s8 + $0x68] sm:$0xff] %vm810_vm2, %v1383_v0  ;;  %v711_v1 = vpop.f32.mrb[13].mxu1 }
 0x105   : > { %823 = vst.msk [vmem:[%s1853_s8 + $0x60] sm:$0xff] %vm810_vm2, %v711_v1 }
 0x107   : > { %v1386_v2 = vpop.f32.mrb[14].mxu1 }
 0x108   : > { %826 = vst.msk [vmem:[%s1853_s8 + $0x78] sm:$0xff] %vm810_vm2, %v1386_v2  ;;  %v721_v3 = vpop.f32.mrb[15].mxu1 }
 0x109   : > { %825 = vst.msk [vmem:[%s1853_s8 + $0x70] sm:$0xff] %vm810_vm2, %v721_v3 }
 0x10b   : > { %v1389_v4 = vpop.f32.mrb[16].mxu1 }
 0x10c   : > { %828 = vst.msk [vmem:[%s1853_s8 + $0x88] sm:$0xff] %vm810_vm2, %v1389_v4  ;;  %v731_v5 = vpop.f32.mrb[17].mxu1 }
 0x10d   : > { %827 = vst.msk [vmem:[%s1853_s8 + $0x80] sm:$0xff] %vm810_vm2, %v731_v5 }
 0x10f   : > { %v1392_v6 = vpop.f32.mrb[18].mxu1 }
 0x110   : > { %830 = vst.msk [vmem:[%s1853_s8 + $0x98] sm:$0xff] %vm810_vm2, %v1392_v6  ;;  %v741_v7 = vpop.f32.mrb[19].mxu1 }
 0x111   : > { %829 = vst.msk [vmem:[%s1853_s8 + $0x90] sm:$0xff] %vm810_vm2, %v741_v7 }
 0x113   : > { %v1395_v8 = vpop.f32.mrb[20].mxu1 }
 0x114   : > { %832 = vst.msk [vmem:[%s1853_s8 + $0xa8] sm:$0xff] %vm810_vm2, %v1395_v8  ;;  %v751_v9 = vpop.f32.mrb[21].mxu1 }
 0x115   : > { %831 = vst.msk [vmem:[%s1853_s8 + $0xa0] sm:$0xff] %vm810_vm2, %v751_v9 }
 0x117   : > { %v1398_v10 = vpop.f32.mrb[22].mxu1 }
 0x118   : > { %834 = vst.msk [vmem:[%s1853_s8 + $0xb8] sm:$0xff] %vm810_vm2, %v1398_v10  ;;  %v761_v11 = vpop.f32.mrb[23].mxu1 }
 0x119   : > { %833 = vst.msk [vmem:[%s1853_s8 + $0xb0] sm:$0xff] %vm810_vm2, %v761_v11 }
 0x11b   : > { %v1401_v12 = vpop.f32.mrb[24].mxu1 }
 0x11c   : > { %836 = vst.msk [vmem:[%s1853_s8 + $0xc8] sm:$0xff] %vm810_vm2, %v1401_v12  ;;  %v771_v13 = vpop.f32.mrb[25].mxu1 }
 0x11d   : > { %835 = vst.msk [vmem:[%s1853_s8 + $0xc0] sm:$0xff] %vm810_vm2, %v771_v13 }
 0x11f   : > { %v1404_v14 = vpop.f32.mrb[26].mxu1 }
 0x120   : > { %838 = vst.msk [vmem:[%s1853_s8 + $0xd8] sm:$0xff] %vm810_vm2, %v1404_v14  ;;  %v781_v15 = vpop.f32.mrb[27].mxu1 }
 0x121   : > { %837 = vst.msk [vmem:[%s1853_s8 + $0xd0] sm:$0xff] %vm810_vm2, %v781_v15 }
 0x123   : > { %v1407_v16 = vpop.f32.mrb[28].mxu1 }
 0x124   : > { %840 = vst.msk [vmem:[%s1853_s8 + $0xe8] sm:$0xff] %vm810_vm2, %v1407_v16  ;;  %v791_v17 = vpop.f32.mrb[29].mxu1 }
 0x125   : > { %839 = vst.msk [vmem:[%s1853_s8 + $0xe0] sm:$0xff] %vm810_vm2, %v791_v17 }
 0x127   : > { %v1410_v18 = vpop.f32.mrb[30].mxu1 }
 0x128   : > { %842 = vst.msk [vmem:[%s1853_s8 + $0xf8] sm:$0xff] %vm810_vm2, %v1410_v18  ;;  %v801_v19 = vpop.f32.mrb[31].mxu1 }
 0x129   : > { %841 = vst.msk [vmem:[%s1853_s8 + $0xf0] sm:$0xff] %vm810_vm2, %v801_v19 }
 0x12b   : > { %v574_v20 = vpop.f32.mrb[0].mxu0 }
 0x12c   : > { %579 = vst [vmem:[%s353_s22] sm:$0xff] %v574_v20  ;;  %v913_v21 = vpop.f32.mrb[32].mxu1  ;;  %v576_v22 = vpop.f32.mrb[1].mxu0 }
 0x12d   : > { %918 = vst [vmem:[%s373_s15] sm:$0xff] %v913_v21  ;;  %580 = vst [vmem:[%s353_s22 + $0x8] sm:$0xff] %v576_v22  ;;  %v915_v23 = vpop.f32.mrb[33].mxu1 }
 0x12e   : > { %919 = vst [vmem:[%s373_s15 + $0x8] sm:$0xff] %v915_v23 }
 0x12f PF: > { %s17_s25 = sadd.s32 1, %s1585_s25   ;;  %s1951_s21 = smov %s1577_s23 }
 0x130   : > { %p14_p8 = scmp.ge.s32.totalorder %s17_s25, 10   ;;  %s1952_s22 = smov %s1581_s24 }
 0x131   : > { %s1953_s23 = smov %s1956_s26  ;;  %s1954_s24 = smov %s1960_s27 }
 0x132   :  { %16 = sbr.rel (!%p14_p8) target bundleno = 3 (0x3), region = 99 }

// kernel: multi_head_attention.4
= control target key start
LH: loop header
LB: loop body
LE: loop exit
PB: predicated region body
PF: predicated region fallthrough
CT: control target
= control target key end

     0   :  { %s1726_s12 = smov 0   ;;  %s1728_s13 = smov 0   ;;  %s2504_s0 = inlined_call_operand.vmem [shape: f32[4,8,512], index: 0, kind: input, shape index: {}]   ;;  %s2505_s1 = inlined_call_operand.vmem [shape: f32[4,512,8], index: 1, kind: input, shape index: {}]   ;;  %s2506_s2 = inlined_call_operand.vmem [shape: f32[4,8,512], index: 2, kind: input, shape index: {}]   ;;  %s2507_s3 = inlined_call_operand.vmem [shape: f32[4,8,512], index: 3, kind: output, shape index: {}]  }
   0x1   :  { %s1730_s14 = smov 0   ;;  %s1732_s15 = smov 0  }
   0x2   :  { %s1734_s16 = smov 0   ;;  %s1736_s17 = smov 0  }
   0x3   :  { %s1738_s18 = smov 0  }
   0x4 LB: > { %s25_s19 = sadd.s32 1, %s1688_s15  ;;  %s28_s20 = sadd.s32 1, %s1692_s16  ;;  %s1700_s18 = sphi %s1738_s18, %s13_s18   ;;  %s1696_s17 = sphi %s1736_s17, %s2695_s17   ;;  %s1692_s16 = sphi %s1734_s16, %s2694_s16   ;;  %s1688_s15 = sphi %s1732_s15, %s2693_s15   ;;  %s1684_s14 = sphi %s1730_s14, %s2692_s14   ;;  %s1680_s13 = sphi %s1728_s13, %s2691_s13   ;;  %s1676_s12 = sphi %s1726_s12, %s2690_s12  }
   0x5   : > { %p26_p0 = scmp.ge.s32.totalorder %s25_s19, 2  ;;  %p1341_p1 = scmp.ge.s32.totalorder %s1700_s18, 1 }
   0x6   : > { %p199_p2 = scmp.lt.s32.totalorder %s1700_s18, 17  ;;  %s32_s21 = sadd.s32 1, %s1696_s17 }
   0x7   : > { %s2697_s19 = smov (%p26_p0, %s25_s19), 0  ;;  %s2699_s20 = smov (!%p26_p0, %s28_s20), %s1692_s16 }
   0x8   : > { %p200_p3 = pnand %p1341_p1, %p199_p2  ;;  %p30_p4 = scmp.ge.s32.totalorder %s2699_s20, 2 }
   0xa   : > { %s2701_s20 = smov (%p30_p4, %s2699_s20), 0  ;;  %s2703_s21 = smov (!%p30_p4, %s32_s21), %s1696_s17 }
   0xb   : > { %p34_p5 = scmp.ge.s32.totalorder %s2703_s21, 4  ;;  %203 = sbr.rel (%p200_p3) target bundleno = 716 (0x2cc), region = 32 }
   0xd   : > { %s2705_s21 = smov (%p34_p5, %s2703_s21), 0 }
  0x12   : > { %s1342_s22 = sshll.u32 %s1680_s13, 1  ;;  %p250_p6 = scmp.lt.s32.totalorder %s1684_s14, 3 }
  0x13   : > { %p252_p7 = scmp.lt.s32.totalorder %s1342_s22, 3  ;;  %s1345_s23 = sshll.u32 %s1676_s12, 5 }
  0x14   : > { %s2707_s14 = smov (!%p250_p6, %s1684_s14), 3  ;;  %p262_p8 = scmp.lt.s32.totalorder %s1345_s23, 63 }
  0x15   : > { %s2709_s22 = smov (!%p252_p7, %s1342_s22), 3  ;;  %s1343_s24 = sshll.u32 %s2707_s14, 2 }
  0x16   : > { %s255_s25 = sadd.s32 %s1343_s24, %s2709_s22  ;;  %s1346_s26 = sshll.u32 %s2707_s14, 6 }
  0x17   : > { %s1344_s27 = sshll.u32 %s255_s25, 3  ;;  %s1348_s28 = sshll.u32 %s1676_s12, 1 }
  0x18   : > { %s257_s4 = scalar_lea.vmem %s2504_s0, %s1344_s27  ;;  %p272_p9 = scmp.lt.s32.totalorder %s1348_s28, 3 }
  0x19   : > { %s2711_s23 = smov (!%p262_p8, %s1345_s23), 63  ;;  %s1778_s8 = scalar_lea.vmem %s2507_s3, %s1344_s27 }
  0x1a   : > { %s2713_s28 = smov (!%p272_p9, %s1348_s28), 3  ;;  %s265_s5 = sadd.s32 %s1346_s26, %s2711_s23 }
  0x1b   : > { %s1347_s9 = sshll.u32 %s265_s5, 3  ;;  %s275_s10 = sadd.s32 %s1343_s24, %s2713_s28 }
  0x1c   : > { %s1783_s14 = scalar_lea.vmem %s2505_s1, %s1347_s9  ;;  %s1350_s22 = sshll.u32 %s275_s10, 3 }
  0x1d   : > { %s1788_s30 = scalar_lea.vmem %s2506_s2, %s1350_s22  ;;  %p1354_p10 = scmp.ne.s32.totalorder %s1676_s12, 0 }
  0x1e   : > { %v293_v0 = vlaneseq (!%p1354_p10)  ;;  %v1702_v1 = vmov (!%p1354_p10), 0.0   ;;  %v1703_v2 = vmov (!%p1354_p10), -inf  }
  0x1f   : > { %292 = sbr.rel (%p1354_p10) target bundleno = 38 (0x26), region = 36  ;;  %299 = vst [vmem:[#allocation4] sm:$0xff] (!%p1354_p10), %v1702_v1  ;;  %300 = vst [vmem:[#allocation4 + $0x8] sm:$0xff] (!%p1354_p10), %v1702_v1 }
  0x20   : > { %vm295_vm0 = vcmp.lt.s32.totalorder (!%p1354_p10), %v293_v0, 256 }
  0x21   : > { %297 = vst.msk [vmem:[#allocation2] sm:$0x3] (!%p1354_p10), %vm295_vm0, %v1703_v2  ;;  %298 = vst.msk [vmem:[#allocation3] sm:$0x3] (!%p1354_p10), %vm295_vm0, %v1702_v1 }
  0x26 PF: > { %v334_v3 = vld [vmem:[%s257_s4 + $0x8] sm:$0xff]  ;;  %v333_v4 = vld [vmem:[%s257_s4] sm:$0xff]  ;;  %vm335_vm1 = vcmask 64512   ;;  %v1704_v6 = vmov 0.0   ;;  %v303_v8 = vld [vmem:[%s1783_s14 + $0x10] sm:$0xff]  ;;  %p1387_p11 = scmp.ne.s32.totalorder %s1676_s12, 1 }
  0x27   : > { %v301_v5 = vld [vmem:[%s1783_s14] sm:$0xff]  ;;  %432 = vmatprep.subr.mxu0 %v334_v3  ;;  %496 = vmatprep.mubr.f32.mxu0 %v1704_v6  ;;  %v302_v7 = vld [vmem:[%s1783_s14 + $0x8] sm:$0xff]  ;;  %v304_v9 = vld [vmem:[%s1783_s14 + $0x18] sm:$0xff] }
  0x28   : > { %433 = vmatpush1.msra.mxu0 %v333_v4  ;;  %v305_v10 = vld [vmem:[%s1783_s14 + $0x20] sm:$0xff]  ;;  %v306_v11 = vld [vmem:[%s1783_s14 + $0x28] sm:$0xff]  ;;  %v307_v12 = vld [vmem:[%s1783_s14 + $0x30] sm:$0xff] }
  0x29   : > { %1355 = vmatmul.mubr.msk.f32.vlgmr.msra.gmra.mrb[0].mxu0 %vm335_vm1, %v301_v5  ;;  %v308_v13 = vld [vmem:[%s1783_s14 + $0x38] sm:$0xff]  ;;  %v309_v14 = vld [vmem:[%s1783_s14 + $0x40] sm:$0xff]  ;;  %v310_v15 = vld [vmem:[%s1783_s14 + $0x48] sm:$0xff] }
  0x2a   : > { %502 = vmatprep.mubr.f32.mxu0 %v1704_v6  ;;  %v311_v16 = vld [vmem:[%s1783_s14 + $0x50] sm:$0xff]  ;;  %v312_v17 = vld [vmem:[%s1783_s14 + $0x58] sm:$0xff]  ;;  %v313_v18 = vld [vmem:[%s1783_s14 + $0x60] sm:$0xff] }
  0x2b   : > { %v314_v19 = vld [vmem:[%s1783_s14 + $0x68] sm:$0xff]  ;;  %v315_v20 = vld [vmem:[%s1783_s14 + $0x70] sm:$0xff]  ;;  %v316_v21 = vld [vmem:[%s1783_s14 + $0x78] sm:$0xff] }
  0x2c   : > { %v317_v22 = vld [vmem:[%s1783_s14 + $0x80] sm:$0xff]  ;;  %v318_v23 = vld [vmem:[%s1783_s14 + $0x88] sm:$0xff]  ;;  %v319_v24 = vld [vmem:[%s1783_s14 + $0x90] sm:$0xff] }
  0x2d   : > { %1356 = vmatmul.mubr.msk.f32.gmra.mrb[2].mxu0 %vm335_vm1, %v302_v7  ;;  %v320_v25 = vld [vmem:[%s1783_s14 + $0x98] sm:$0xff]  ;;  %v321_v26 = vld [vmem:[%s1783_s14 + $0xa0] sm:$0xff]  ;;  %v322_v27 = vld [vmem:[%s1783_s14 + $0xa8] sm:$0xff] }
  0x2e   : > { %508 = vmatprep.mubr.f32.mxu0 %v1704_v6  ;;  %v323_v28 = vld [vmem:[%s1783_s14 + $0xb0] sm:$0xff]  ;;  %v324_v29 = vld [vmem:[%s1783_s14 + $0xb8] sm:$0xff]  ;;  %v325_v30 = vld [vmem:[%s1783_s14 + $0xc0] sm:$0xff] }
  0x2f   : > { %v326_v31 = vld [vmem:[%s1783_s14 + $0xc8] sm:$0xff]  ;;  %v327_v32 = vld [vmem:[%s1783_s14 + $0xd0] sm:$0xff]  ;;  %v328_v33 = vld [vmem:[%s1783_s14 + $0xd8] sm:$0xff] }
  0x30   : > { %v329_v34 = vld [vmem:[%s1783_s14 + $0xe0] sm:$0xff]  ;;  %v330_v35 = vld [vmem:[%s1783_s14 + $0xe8] sm:$0xff]  ;;  %v331_v36 = vld [vmem:[%s1783_s14 + $0xf0] sm:$0xff] }
  0x31   : > { %1357 = vmatmul.mubr.msk.f32.gmra.mrb[4].mxu0 %vm335_vm1, %v303_v8  ;;  %v332_v37 = vld [vmem:[%s1783_s14 + $0xf8] sm:$0xff] }
  0x32   : > { %514 = vmatprep.mubr.f32.mxu0 %v1704_v6 }
  0x35   : > { %1358 = vmatmul.mubr.msk.f32.gmra.mrb[6].mxu0 %vm335_vm1, %v304_v9 }
  0x36   : > { %520 = vmatprep.mubr.f32.mxu0 %v1704_v6 }
  0x39   : > { %1359 = vmatmul.mubr.msk.f32.gmra.mrb[8].mxu0 %vm335_vm1, %v305_v10 }
  0x3a   : > { %526 = vmatprep.mubr.f32.mxu0 %v1704_v6 }
  0x3d   : > { %1360 = vmatmul.mubr.msk.f32.gmra.mrb[10].mxu0 %vm335_vm1, %v306_v11 }
  0x3e   : > { %532 = vmatprep.mubr.f32.mxu0 %v1704_v6 }
  0x41   : > { %1361 = vmatmul.mubr.msk.f32.gmra.mrb[12].mxu0 %vm335_vm1, %v307_v12 }
  0x42   : > { %538 = vmatprep.mubr.f32.mxu0 %v1704_v6 }
  0x45   : > { %1362 = vmatmul.mubr.msk.f32.gmra.mrb[14].mxu0 %vm335_vm1, %v308_v13 }
  0x46   : > { %544 = vmatprep.mubr.f32.mxu0 %v1704_v6 }
  0x49   : > { %1363 = vmatmul.mubr.msk.f32.gmra.mrb[16].mxu0 %vm335_vm1, %v309_v14 }
  0x4a   : > { %550 = vmatprep.mubr.f32.mxu0 %v1704_v6 }
  0x4d   : > { %1364 = vmatmul.mubr.msk.f32.gmra.mrb[18].mxu0 %vm335_vm1, %v310_v15 }
  0x4e   : > { %556 = vmatprep.mubr.f32.mxu0 %v1704_v6 }
  0x51   : > { %1365 = vmatmul.mubr.msk.f32.gmra.mrb[20].mxu0 %vm335_vm1, %v311_v16 }
  0x52   : > { %562 = vmatprep.mubr.f32.mxu0 %v1704_v6 }
  0x55   : > { %1366 = vmatmul.mubr.msk.f32.gmra.mrb[22].mxu0 %vm335_vm1, %v312_v17 }
  0x56   : > { %568 = vmatprep.mubr.f32.mxu0 %v1704_v6 }
  0x59   : > { %1367 = vmatmul.mubr.msk.f32.gmra.mrb[24].mxu0 %vm335_vm1, %v313_v18 }
  0x5a   : > { %574 = vmatprep.mubr.f32.mxu0 %v1704_v6 }
  0x5d   : > { %1368 = vmatmul.mubr.msk.f32.gmra.mrb[26].mxu0 %vm335_vm1, %v314_v19 }
  0x5e   : > { %580 = vmatprep.mubr.f32.mxu0 %v1704_v6 }
  0x61   : > { %1369 = vmatmul.mubr.msk.f32.gmra.mrb[28].mxu0 %vm335_vm1, %v315_v20 }
  0x62   : > { %586 = vmatprep.mubr.f32.mxu0 %v1704_v6 }
  0x65   : > { %1370 = vmatmul.mubr.msk.f32.gmra.mrb[30].mxu0 %vm335_vm1, %v316_v21 }
  0x66   : > { %592 = vmatprep.mubr.f32.mxu0 %v1704_v6 }
  0x69   : > { %1371 = vmatmul.mubr.msk.f32.gmra.mrb[32].mxu0 %vm335_vm1, %v317_v22 }
  0x6a   : > { %598 = vmatprep.mubr.f32.mxu0 %v1704_v6 }
  0x6d   : > { %1372 = vmatmul.mubr.msk.f32.gmra.mrb[34].mxu0 %vm335_vm1, %v318_v23 }
  0x6e   : > { %604 = vmatprep.mubr.f32.mxu0 %v1704_v6 }
  0x71   : > { %1373 = vmatmul.mubr.msk.f32.gmra.mrb[36].mxu0 %vm335_vm1, %v319_v24 }
  0x72   : > { %610 = vmatprep.mubr.f32.mxu0 %v1704_v6 }
  0x75   : > { %1374 = vmatmul.mubr.msk.f32.gmra.mrb[38].mxu0 %vm335_vm1, %v320_v25 }
  0x76   : > { %616 = vmatprep.mubr.f32.mxu0 %v1704_v6 }
  0x79   : > { %1375 = vmatmul.mubr.msk.f32.gmra.mrb[40].mxu0 %vm335_vm1, %v321_v26 }
  0x7a   : > { %622 = vmatprep.mubr.f32.mxu0 %v1704_v6 }
  0x7d   : > { %1376 = vmatmul.mubr.msk.f32.gmra.mrb[42].mxu0 %vm335_vm1, %v322_v27 }
  0x7e   : > { %628 = vmatprep.mubr.f32.mxu0 %v1704_v6 }
  0x81   : > { %1377 = vmatmul.mubr.msk.f32.gmra.mrb[44].mxu0 %vm335_vm1, %v323_v28 }
  0x82   : > { %634 = vmatprep.mubr.f32.mxu0 %v1704_v6 }
  0x85   : > { %1378 = vmatmul.mubr.msk.f32.gmra.mrb[46].mxu0 %vm335_vm1, %v324_v29 }
  0x86   : > { %640 = vmatprep.mubr.f32.mxu0 %v1704_v6 }
  0x89   : > { %1379 = vmatmul.mubr.msk.f32.gmra.mrb[48].mxu0 %vm335_vm1, %v325_v30 }
  0x8a   : > { %646 = vmatprep.mubr.f32.mxu0 %v1704_v6 }
  0x8d   : > { %1380 = vmatmul.mubr.msk.f32.gmra.mrb[50].mxu0 %vm335_vm1, %v326_v31 }
  0x8e   : > { %652 = vmatprep.mubr.f32.mxu0 %v1704_v6 }
  0x91   : > { %1381 = vmatmul.mubr.msk.f32.gmra.mrb[52].mxu0 %vm335_vm1, %v327_v32 }
  0x92   : > { %658 = vmatprep.mubr.f32.mxu0 %v1704_v6 }
  0x95   : > { %1382 = vmatmul.mubr.msk.f32.gmra.mrb[54].mxu0 %vm335_vm1, %v328_v33 }
  0x96   : > { %664 = vmatprep.mubr.f32.mxu0 %v1704_v6 }
  0x99   : > { %1383 = vmatmul.mubr.msk.f32.gmra.mrb[56].mxu0 %vm335_vm1, %v329_v34 }
  0x9a   : > { %670 = vmatprep.mubr.f32.mxu0 %v1704_v6 }
  0x9d   : > { %1384 = vmatmul.mubr.msk.f32.gmra.mrb[58].mxu0 %vm335_vm1, %v330_v35 }
  0x9e   : > { %676 = vmatprep.mubr.f32.mxu0 %v1704_v6 }
  0xa1   : > { %1385 = vmatmul.mubr.msk.f32.gmra.mrb[60].mxu0 %vm335_vm1, %v331_v36 }
  0xa2   : > { %682 = vmatprep.mubr.f32.mxu0 %v1704_v6 }
  0xa5   : > { %1386 = vmatmul.mubr.msk.f32.gmra.mrb[62].mxu0 %vm335_vm1, %v332_v37 }
  0xfc   : > { %v1887_v38 = vpop.f32.mrb[0].mxu0 }
  0xfd   : > { %v1889_v39 = vpop.f32.mrb[1].mxu0 }
 0x100   : > { %v1891_v40 = vpop.f32.mrb[2].mxu0 }
 0x101   : > { %v1893_v41 = vpop.f32.mrb[3].mxu0 }
 0x104   : > { %v1895_v42 = vpop.f32.mrb[4].mxu0 }
 0x105   : > { %v690_v43 = vmax.f32 %v1887_v38, %v1895_v42  ;;  %v1899_v44 = vpop.f32.mrb[5].mxu0 }
 0x106   : > { %v727_v45 = vmax.f32 %v1889_v39, %v1899_v44 }
 0x108   : > { %v1903_v46 = vpop.f32.mrb[6].mxu0 }
 0x109   : > { %v691_v47 = vmax.f32 %v1891_v40, %v1903_v46  ;;  %v1907_v48 = vpop.f32.mrb[7].mxu0 }
 0x10a   : > { %v728_v49 = vmax.f32 %v1893_v41, %v1907_v48 }
 0x10c   : > { %v1911_v50 = vpop.f32.mrb[8].mxu0 }
 0x10d   : > { %v692_v51 = vmax.f32 %v690_v43, %v1911_v50  ;;  %v1914_v52 = vpop.f32.mrb[9].mxu0 }
 0x10e   : > { %v729_v53 = vmax.f32 %v727_v45, %v1914_v52 }
 0x110   : > { %v1917_v54 = vpop.f32.mrb[10].mxu0 }
 0x111   : > { %v693_v55 = vmax.f32 %v691_v47, %v1917_v54  ;;  %v1920_v56 = vpop.f32.mrb[11].mxu0 }
 0x112   : > { %v730_v57 = vmax.f32 %v728_v49, %v1920_v56 }
 0x114   : > { %v1923_v58 = vpop.f32.mrb[12].mxu0 }
 0x115   : > { %v694_v59 = vmax.f32 %v692_v51, %v1923_v58  ;;  %v1926_v60 = vpop.f32.mrb[13].mxu0 }
 0x116   : > { %v731_v61 = vmax.f32 %v729_v53, %v1926_v60 }
 0x118   : > { %v1929_v62 = vpop.f32.mrb[14].mxu0 }
 0x119   : > { %v695_v63 = vmax.f32 %v693_v55, %v1929_v62  ;;  %v1932_v0 = vpop.f32.mrb[15].mxu0 }
 0x11a   : > { %v732_v1 = vmax.f32 %v730_v57, %v1932_v0 }
 0x11c   : > { %v1935_v2 = vpop.f32.mrb[16].mxu0 }
 0x11d   : > { %v696_v3 = vmax.f32 %v694_v59, %v1935_v2  ;;  %v1938_v4 = vpop.f32.mrb[17].mxu0 }
 0x11e   : > { %v733_v5 = vmax.f32 %v731_v61, %v1938_v4 }
 0x120   : > { %v1941_v6 = vpop.f32.mrb[18].mxu0 }
 0x121   : > { %v697_v7 = vmax.f32 %v695_v63, %v1941_v6  ;;  %v1944_v8 = vpop.f32.mrb[19].mxu0 }
 0x122   : > { %v734_v9 = vmax.f32 %v732_v1, %v1944_v8 }
 0x124   : > { %v1947_v10 = vpop.f32.mrb[20].mxu0 }
 0x125   : > { %v698_v11 = vmax.f32 %v696_v3, %v1947_v10  ;;  %v1950_v12 = vpop.f32.mrb[21].mxu0 }
 0x126   : > { %v735_v13 = vmax.f32 %v733_v5, %v1950_v12 }
 0x128   : > { %v1953_v14 = vpop.f32.mrb[22].mxu0 }
 0x129   : > { %v699_v15 = vmax.f32 %v697_v7, %v1953_v14  ;;  %v1956_v16 = vpop.f32.mrb[23].mxu0 }
 0x12a   : > { %v736_v17 = vmax.f32 %v734_v9, %v1956_v16 }
 0x12c   : > { %v1959_v18 = vpop.f32.mrb[24].mxu0 }
 0x12d   : > { %v700_v19 = vmax.f32 %v698_v11, %v1959_v18  ;;  %v1962_v20 = vpop.f32.mrb[25].mxu0 }
 0x12e   : > { %v737_v21 = vmax.f32 %v735_v13, %v1962_v20 }
 0x130   : > { %v1965_v22 = vpop.f32.mrb[26].mxu0 }
 0x131   : > { %v701_v23 = vmax.f32 %v699_v15, %v1965_v22  ;;  %v1968_v24 = vpop.f32.mrb[27].mxu0 }
 0x132   : > { %v738_v25 = vmax.f32 %v736_v17, %v1968_v24 }
 0x134   : > { %v1971_v26 = vpop.f32.mrb[28].mxu0 }
 0x135   : > { %v702_v27 = vmax.f32 %v700_v19, %v1971_v26  ;;  %v1974_v28 = vpop.f32.mrb[29].mxu0 }
 0x136   : > { %v739_v29 = vmax.f32 %v737_v21, %v1974_v28 }
 0x138   : > { %v1977_v30 = vpop.f32.mrb[30].mxu0 }
 0x139   : > { %v703_v31 = vmax.f32 %v701_v23, %v1977_v30  ;;  %v1980_v32 = vpop.f32.mrb[31].mxu0 }
 0x13a   : > { %v740_v33 = vmax.f32 %v738_v25, %v1980_v32 }
 0x13c   : > { %v1983_v34 = vpop.f32.mrb[32].mxu0 }
 0x13d   : > { %v704_v35 = vmax.f32 %v702_v27, %v1983_v34  ;;  %v1986_v36 = vpop.f32.mrb[33].mxu0 }
 0x13e   : > { %v741_v37 = vmax.f32 %v739_v29, %v1986_v36 }
 0x140   : > { %v1989_v43 = vpop.f32.mrb[34].mxu0 }
 0x141   : > { %v705_v45 = vmax.f32 %v703_v31, %v1989_v43  ;;  %v1992_v47 = vpop.f32.mrb[35].mxu0 }
 0x142   : > { %v742_v49 = vmax.f32 %v740_v33, %v1992_v47 }
 0x144   : > { %v1995_v51 = vpop.f32.mrb[36].mxu0 }
 0x145   : > { %v706_v53 = vmax.f32 %v704_v35, %v1995_v51  ;;  %v1998_v55 = vpop.f32.mrb[37].mxu0 }
 0x146   : > { %v743_v57 = vmax.f32 %v741_v37, %v1998_v55 }
 0x148   : > { %v2001_v59 = vpop.f32.mrb[38].mxu0 }
 0x149   : > { %v707_v61 = vmax.f32 %v705_v45, %v2001_v59  ;;  %v2004_v63 = vpop.f32.mrb[39].mxu0 }
 0x14a   : > { %v744_v1 = vmax.f32 %v742_v49, %v2004_v63 }
 0x14c   : > { %v2007_v3 = vpop.f32.mrb[40].mxu0 }
 0x14d   : > { %2558 = vst [vmem:[#allocation5_spill] sm:$0xff] %v2007_v3  ;;  %v708_v5 = vmax.f32 %v706_v53, %v2007_v3  ;;  %v2010_v7 = vpop.f32.mrb[41].mxu0 }
 0x14e   : > { %2559 = vst [vmem:[#allocation6_spill] sm:$0xff] %v2010_v7  ;;  %v745_v9 = vmax.f32 %v743_v57, %v2010_v7 }
 0x150   : > { %v2013_v11 = vpop.f32.mrb[42].mxu0 }
 0x151   : > { %2560 = vst [vmem:[#allocation7_spill] sm:$0xff] %v2013_v11  ;;  %v709_v13 = vmax.f32 %v707_v61, %v2013_v11  ;;  %v2016_v15 = vpop.f32.mrb[43].mxu0 }
 0x152   : > { %2561 = vst [vmem:[#allocation8_spill] sm:$0xff] %v2016_v15  ;;  %v746_v17 = vmax.f32 %v744_v1, %v2016_v15 }
 0x154   : > { %v2019_v19 = vpop.f32.mrb[44].mxu0 }
 0x155   : > { %2562 = vst [vmem:[#allocation9_spill] sm:$0xff] %v2019_v19  ;;  %v710_v21 = vmax.f32 %v708_v5, %v2019_v19  ;;  %v2022_v23 = vpop.f32.mrb[45].mxu0 }
 0x156   : > { %2563 = vst [vmem:[#allocation10_spill] sm:$0xff] %v2022_v23  ;;  %v747_v25 = vmax.f32 %v745_v9, %v2022_v23  ;;  %v1705_v23 = vmov 1966171168  }
 0x158   : > { %v2025_v27 = vpop.f32.mrb[46].mxu0 }
 0x159   : > { %2564 = vst [vmem:[#allocation11_spill] sm:$0xff] %v2025_v27  ;;  %v711_v29 = vmax.f32 %v709_v13, %v2025_v27  ;;  %v2028_v31 = vpop.f32.mrb[47].mxu0 }
 0x15a   : > { %2565 = vst [vmem:[#allocation12_spill] sm:$0xff] %v2028_v31  ;;  %v748_v33 = vmax.f32 %v746_v17, %v2028_v31 }
 0x15c   : > { %v2031_v35 = vpop.f32.mrb[48].mxu0 }
 0x15d   : > { %2566 = vst [vmem:[#allocation13_spill] sm:$0xff] %v2031_v35  ;;  %v712_v37 = vmax.f32 %v710_v21, %v2031_v35  ;;  %v2034_v45 = vpop.f32.mrb[49].mxu0 }
 0x15e   : > { %2567 = vst [vmem:[#allocation14_spill] sm:$0xff] %v2034_v45  ;;  %v749_v49 = vmax.f32 %v747_v25, %v2034_v45 }
 0x160   : > { %v2037_v53 = vpop.f32.mrb[50].mxu0 }
 0x161   : > { %2568 = vst [vmem:[#allocation15_spill] sm:$0xff] %v2037_v53  ;;  %v713_v57 = vmax.f32 %v711_v29, %v2037_v53  ;;  %v2040_v61 = vpop.f32.mrb[51].mxu0 }
 0x162   : > { %2569 = vst [vmem:[#allocation16_spill] sm:$0xff] %v2040_v61  ;;  %v750_v1 = vmax.f32 %v748_v33, %v2040_v61 }
 0x164   : > { %v2043_v5 = vpop.f32.mrb[52].mxu0 }
 0x165   : > { %2570 = vst [vmem:[#allocation17_spill] sm:$0xff] %v2043_v5  ;;  %v714_v9 = vmax.f32 %v712_v37, %v2043_v5  ;;  %v2046_v13 = vpop.f32.mrb[53].mxu0 }
 0x166   : > { %2571 = vst [vmem:[#allocation18_spill] sm:$0xff] %v2046_v13  ;;  %v751_v17 = vmax.f32 %v749_v49, %v2046_v13 }
 0x168   : > { %v2049_v21 = vpop.f32.mrb[54].mxu0 }
 0x169   : > { %2572 = vst [vmem:[#allocation19_spill] sm:$0xff] %v2049_v21  ;;  %v715_v25 = vmax.f32 %v713_v57, %v2049_v21  ;;  %v2052_v45 = vpop.f32.mrb[55].mxu0 }
 0x16a   : > { %2573 = vst [vmem:[#allocation20_spill] sm:$0xff] %v2052_v45  ;;  %v752_v29 = vmax.f32 %v750_v1, %v2052_v45 }
 0x16c   : > { %v2055_v53 = vpop.f32.mrb[56].mxu0 }
 0x16d   : > { %2574 = vst [vmem:[#allocation21_spill] sm:$0xff] %v2055_v53  ;;  %v716_v33 = vmax.f32 %v714_v9, %v2055_v53  ;;  %v2058_v61 = vpop.f32.mrb[57].mxu0 }
 0x16e   : > { %2575 = vst [vmem:[#allocation22_spill] sm:$0xff] %v2058_v61  ;;  %v753_v37 = vmax.f32 %v751_v17, %v2058_v61 }
 0x170   : > { %v2061_v5 = vpop.f32.mrb[58].mxu0 }
 0x171   : > { %2576 = vst [vmem:[#allocation23_spill] sm:$0xff] %v2061_v5  ;;  %v717_v49 = vmax.f32 %v715_v25, %v2061_v5  ;;  %v2064_v13 = vpop.f32.mrb[59].mxu0 }
 0x172   : > { %2577 = vst [vmem:[#allocation24_spill] sm:$0xff] %v2064_v13  ;;  %v754_v57 = vmax.f32 %v752_v29, %v2064_v13 }
 0x174   : > { %v2067_v21 = vpop.f32.mrb[60].mxu0 }
 0x175   : > { %2578 = vst [vmem:[#allocation25_spill] sm:$0xff] %v2067_v21  ;;  %v718_v1 = vmax.f32 %v716_v33, %v2067_v21  ;;  %v2070_v45 = vpop.f32.mrb[61].mxu0  ;;  %v768_v33 = vunpack.c.l.s4 %v1705_v23  ;;  %v770_v21 = vlaneseq }
 0x176   : > { %2579 = vst [vmem:[#allocation26_spill] sm:$0xff] %v2070_v45  ;;  %v755_v9 = vmax.f32 %v753_v37, %v2070_v45 }
 0x177   : > { %v769_v11 = vunpack.c.0.s8 %v768_v33  ;;  %vm2088_vm2 = vcmp.lt.s32.totalorder %v770_v21, 256 }
 0x178   : > { %v2073_v53 = vpop.f32.mrb[62].mxu0 }
 0x179   : > { %2580 = vst [vmem:[#allocation27_spill] sm:$0xff] %v2073_v53  ;;  %v719_v17 = vmax.f32 %v717_v49, %v2073_v53  ;;  %v2076_v61 = vpop.f32.mrb[63].mxu0  ;;  %v771_v49 = vshrl.u32 %v770_v21, 7 }
 0x17a   : > { %2581 = vst [vmem:[#allocation28_spill] sm:$0xff] %v2076_v61  ;;  %v756_v25 = vmax.f32 %v754_v57, %v2076_v61 }
 0x17b   : > { %v720_v5 = vmax.f32 %v718_v1, %v719_v17  ;;  %v2079_v1 = vsub.s32 %v769_v11, %v771_v49  ;;  %v2084_v17 = vsub.s32 0, %v771_v49 }
 0x17c   : > { %v757_v35 = vmax.f32 %v755_v9, %v756_v25 }
 0x17d   : > { %v721_v31 = vrot.slane %v720_v5, 4  ;;  %2582 = vst [vmem:[#allocation29_spill] sm:$0xff] %v2079_v1 }
 0x17e   : > { %v758_v29 = vrot.slane %v757_v35, 4 }
 0x17f   : > { %v722_v13 = vmax.f32 %v720_v5, %v721_v31  ;;  %v689_v5 = vld [vmem:[#allocation2] sm:$0x3] }
 0x180   : > { %v759_v27 = vmax.f32 %v757_v35, %v758_v29  ;;  %v1105_v35 = vld [vmem:[%s1788_s30 + $0x8] sm:$0xff] }
 0x181   : > { %v723_v19 = vrot.slane %v722_v13, 2  ;;  %1170 = vmatprep.mubr.f32.mxu1 %v1105_v35 }
 0x182   : > { %v760_v37 = vrot.slane %v759_v27, 2 }
 0x183   : > { %v724_v45 = vmax.f32 %v722_v13, %v723_v19  ;;  %v2086_v19 = vsub.s32 1, %v771_v49  ;;  %v2608_v49 = vld [vmem:[#allocation27_spill] sm:$0xff] }
 0x184   : > { %v761_v15 = vmax.f32 %v759_v27, %v760_v37  ;;  %v2583_v27 = vmov 0 }
 0x185   : > { %v725_v53 = vrot.slane %v724_v45, 1  ;;  %v2584_v27 = vsel %vm2088_vm2, 4294967295, %v2583_v27 }
 0x186   : > { %v762_v7 = vrot.slane %v761_v15, 1  ;;  %2585 = vst [vmem:[#allocation30_spill] sm:$0xff] %v2584_v27  ;;  %v2602_v27 = vld [vmem:[#allocation21_spill] sm:$0xff] }
 0x187   : > { %v726_v3 = vmax.f32 %v724_v45, %v725_v53 }
 0x188   : > { %v763_v57 = vmax.f32 %v761_v15, %v762_v7 }
 0x18a   : > { %v766_v9 = vcombine.low %v726_v3, %v763_v57  ;;  %v2607_v57 = vld [vmem:[#allocation26_spill] sm:$0xff] }
 0x18c   : > { %v773_v31 = vrot.slane %v766_v9, %v2079_v1  ;;  %v2604_v9 = vld [vmem:[#allocation23_spill] sm:$0xff] }
 0x18e   : > { %v780_v23 = vrot.slane %v773_v31, %v2079_v1  ;;  %v2605_v31 = vld [vmem:[#allocation24_spill] sm:$0xff] }
 0x190   : > { %v782_v45 = vmax.f32 %v689_v5, %v780_v23  ;;  %v2587_v23 = vld [vmem:[#allocation6_spill] sm:$0xff] }
 0x192   : > { %v783_v7 = vsub.f32 %v689_v5, %v782_v45  ;;  %v2093_v11 = vrot.slane %v782_v45, %v2084_v17  ;;  %v2096_v3 = vrot.slane %v782_v45, %v2086_v19  ;;  %1181 = vst.msk [vmem:[#allocation2] sm:$0x3] %vm2088_vm2, %v782_v45  ;;  %v2586_v5 = vld [vmem:[#allocation5_spill] sm:$0xff]  ;;  %v2588_v45 = vld [vmem:[#allocation7_spill] sm:$0xff] }
 0x194   : > { %v784_v37 = vmul.f32 1.442695, %v783_v7  ;;  %v2589_v7 = vld [vmem:[#allocation8_spill] sm:$0xff]  ;;  %v2609_v29 = vsub.f32 %v1887_v38, %v2093_v11  ;;  %v2610_v25 = vsub.f32 %v1889_v39, %v2096_v3  ;;  %v2611_v13 = vsub.f32 %v1891_v40, %v2093_v11 }
 0x195   : > { %v2612_v53 = vsub.f32 %v1893_v41, %v2096_v3  ;;  %v2613_v33 = vsub.f32 %v1895_v42, %v2093_v11  ;;  %v2614_v38 = vsub.f32 %v1899_v44, %v2096_v3  ;;  %v2616_v41 = vsub.f32 %v1907_v48, %v2096_v3 }
 0x196   : > { %v861_v1 = vmul.f32 1.442695, %v2609_v29  ;;  %v863_v21 = vmul.f32 1.442695, %v2610_v25  ;;  %1514 = vpow2.f32 %v784_v37  ;;  %v865_v35 = vmul.f32 1.442695, %v2611_v13 }
 0x197   : > { %v867_v15 = vmul.f32 1.442695, %v2612_v53  ;;  %v869_v61 = vmul.f32 1.442695, %v2613_v33  ;;  %v871_v39 = vmul.f32 1.442695, %v2614_v38  ;;  %v2615_v25 = vsub.f32 %v1903_v46, %v2093_v11 }
 0x198   : > { %1516 = vpow2.f32 %v861_v1  ;;  %v875_v53 = vmul.f32 1.442695, %v2616_v41  ;;  %v2617_v42 = vsub.f32 %v1911_v50, %v2093_v11  ;;  %v2618_v44 = vsub.f32 %v1914_v52, %v2096_v3 }
 0x199   : > { %1518 = vpow2.f32 %v863_v21  ;;  %v873_v40 = vmul.f32 1.442695, %v2615_v25  ;;  %v2619_v46 = vsub.f32 %v1917_v54, %v2093_v11  ;;  %v2620_v48 = vsub.f32 %v1920_v56, %v2096_v3 }
 0x19a   : > { %1520 = vpow2.f32 %v865_v35  ;;  %v877_v1 = vmul.f32 1.442695, %v2617_v42  ;;  %v879_v13 = vmul.f32 1.442695, %v2618_v44  ;;  %v2621_v50 = vsub.f32 %v1923_v58, %v2093_v11 }
 0x19b   : > { %1522 = vpow2.f32 %v867_v15  ;;  %v881_v21 = vmul.f32 1.442695, %v2619_v46  ;;  %v883_v15 = vmul.f32 1.442695, %v2620_v48  ;;  %v2622_v52 = vsub.f32 %v1926_v60, %v2096_v3 }
 0x19c   : > { %1524 = vpow2.f32 %v869_v61  ;;  %v885_v61 = vmul.f32 1.442695, %v2621_v50  ;;  %v2623_v54 = vsub.f32 %v1929_v62, %v2093_v11  ;;  %v2624_v38 = vsub.f32 %v1932_v0, %v2096_v3 }
 0x19d   : > { %1526 = vpow2.f32 %v871_v39  ;;  %v887_v33 = vmul.f32 1.442695, %v2622_v52  ;;  %v2625_v25 = vsub.f32 %v1935_v2, %v2093_v11  ;;  %v2626_v41 = vsub.f32 %v1938_v4, %v2096_v3 }
 0x19e   : > { %1528 = vpow2.f32 %v873_v40  ;;  %v889_v35 = vmul.f32 1.442695, %v2623_v54  ;;  %v891_v58 = vmul.f32 1.442695, %v2624_v38  ;;  %v2627_v42 = vsub.f32 %v1941_v6, %v2093_v11 }
 0x19f   : > { %1530 = vpow2.f32 %v875_v53  ;;  %v893_v40 = vmul.f32 1.442695, %v2625_v25  ;;  %v895_v53 = vmul.f32 1.442695, %v2626_v41  ;;  %v2628_v44 = vsub.f32 %v1944_v8, %v2096_v3 }
 0x1a0   : > { %1532 = vpow2.f32 %v877_v1  ;;  %v2267_v29 = vpop.eup %1514  ;;  %v897_v0 = vmul.f32 1.442695, %v2627_v42  ;;  %v2629_v46 = vsub.f32 %v1947_v10, %v2093_v11  ;;  %v2630_v48 = vsub.f32 %v1950_v12, %v2096_v3 }
 0x1a1   : > { %1534 = vpow2.f32 %v879_v13  ;;  %v899_v2 = vmul.f32 1.442695, %v2628_v44  ;;  %v2631_v6 = vsub.f32 %v1953_v14, %v2093_v11  ;;  %v2632_v8 = vsub.f32 %v1956_v16, %v2096_v3 }
 0x1a2   : > { %v1517_v37 = vpop.eup %1516  ;;  %1536 = vpow2.f32 %v881_v21  ;;  %v901_v4 = vmul.f32 1.442695, %v2629_v46  ;;  %v2633_v10 = vsub.f32 %v1959_v18, %v2093_v11  ;;  %v2634_v54 = vsub.f32 %v1962_v20, %v2096_v3 }
 0x1a3   : > { %v1519_v56 = vpop.eup %1518  ;;  %1538 = vpow2.f32 %v883_v15  ;;  %v903_v15 = vmul.f32 1.442695, %v2630_v48  ;;  %v905_v50 = vmul.f32 1.442695, %v2631_v6  ;;  %v907_v52 = vmul.f32 1.442695, %v2632_v8 }
 0x1a4   : > { %v1521_v39 = vpop.eup %1520  ;;  %1540 = vpow2.f32 %v885_v61  ;;  %v911_v12 = vmul.f32 1.442695, %v2634_v54  ;;  %v2635_v14 = vsub.f32 %v1965_v22, %v2093_v11 }
 0x1a5   : > { %v1523_v60 = vpop.eup %1522  ;;  %1542 = vpow2.f32 %v887_v33  ;;  %v909_v33 = vmul.f32 1.442695, %v2633_v10  ;;  %v991_v16 = vadd.f32 %v1521_v39, %v1517_v37  ;;  %v2639_v10 = vsub.f32 %v1977_v30, %v2093_v11 }
 0x1a6   : > { %v2284_v62 = vpop.eup %1524  ;;  %1544 = vpow2.f32 %v889_v35  ;;  %v913_v38 = vmul.f32 1.442695, %v2635_v14  ;;  %v1028_v41 = vadd.f32 %v1523_v60, %v1519_v56  ;;  %v1390_v18 = vpack.c.bf16 %v1523_v60, %v1519_v56 }
 0x1a7   : > { %v1527_v1 = vpop.eup %1526  ;;  %1546 = vpow2.f32 %v891_v58  ;;  %v2636_v58 = vsub.f32 %v1968_v24, %v2096_v3  ;;  %v992_v20 = vadd.f32 %v2284_v62, %v991_v16  ;;  %v1099_v56 = vrot.slane %v2267_v29, %v2086_v19 }
 0x1a8   : > { %v1529_v13 = vpop.eup %1528  ;;  %1548 = vpow2.f32 %v893_v40  ;;  %v1029_v22 = vadd.f32 %v1527_v1, %v1028_v41  ;;  %1391 = vmatprep.subr.bf16.mxu1 %v1390_v18  ;;  %v2637_v60 = vsub.f32 %v1971_v26, %v2093_v11  ;;  %v921_v26 = vmul.f32 1.442695, %v2639_v10 }
 0x1a9   : > { %v1531_v21 = vpop.eup %1530  ;;  %1550 = vpow2.f32 %v895_v53  ;;  %v915_v25 = vmul.f32 1.442695, %v2636_v58  ;;  %v1392_v53 = vpack.c.bf16 %v1521_v39, %v1517_v37  ;;  %v1396_v44 = vpack.c.bf16 %v1529_v13, %v2284_v62 }
 0x1aa   : > { %v2301_v61 = vpop.eup %1532  ;;  %1552 = vpow2.f32 %v897_v0  ;;  %v1394_v0 = vpack.c.bf16 %v1531_v21, %v1527_v1  ;;  %v1095_v37 = vrot.slane %v2267_v29, %v2084_v17  ;;  %v917_v62 = vmul.f32 1.442695, %v2637_v60 }
 0x1ab   : > { %v1535_v35 = vpop.eup %1534  ;;  %1554 = vpow2.f32 %v899_v2  ;;  %1393 = vmatpush1.bf16.msra.mxu1 %v1392_v53  ;;  %v1030_v1 = vadd.f32 %v1531_v21, %v1029_v22  ;;  %v2641_v58 = vsub.f32 %v1983_v34, %v2093_v11  ;;  %v2643_v18 = vsub.f32 %v1989_v43, %v2093_v11 }
 0x1ac   : > { %v1537_v40 = vpop.eup %1536  ;;  %1556 = vpow2.f32 %v901_v4  ;;  %v993_v4 = vadd.f32 %v1529_v13, %v992_v20  ;;  %1395 = vmatprep.subr.bf16.mxu1 %v1394_v0  ;;  %v2638_v13 = vsub.f32 %v1974_v28, %v2096_v3  ;;  %v2644_v0 = vsub.f32 %v1992_v47, %v2096_v3 }
 0x1ad   : > { %v1539_v42 = vpop.eup %1538  ;;  %1558 = vpow2.f32 %v903_v15  ;;  %v1400_v46 = vpack.c.bf16 %v1537_v40, %v2301_v61  ;;  %v929_v34 = vmul.f32 1.442695, %v2643_v18  ;;  %v2645_v22 = vsub.f32 %v1995_v51, %v2093_v11  ;;  %v2655_v18 = vld [vmem:[#allocation10_spill] sm:$0xff] }
 0x1ae   : > { %v2320_v2 = vpop.eup %1540  ;;  %1560 = vpow2.f32 %v905_v50  ;;  %v1398_v24 = vpack.c.bf16 %v1539_v42, %v1535_v35  ;;  %v919_v6 = vmul.f32 1.442695, %v2638_v13  ;;  %v994_v50 = vadd.f32 %v2301_v61, %v993_v4 }
 0x1af   : > { %v1543_v48 = vpop.eup %1542  ;;  %1562 = vpow2.f32 %v907_v52  ;;  %1397 = vmatpush1.bf16.msra.mxu1 %v1396_v44  ;;  %v2649_v10 = vsub.f32 %v2586_v5, %v2093_v11 }
 0x1b0   : > { %v1545_v39 = vpop.eup %1544  ;;  %1564 = vpow2.f32 %v909_v33  ;;  %v1031_v33 = vadd.f32 %v1535_v35, %v1030_v1  ;;  %v995_v14 = vadd.f32 %v1537_v40, %v994_v50  ;;  %1399 = vmatprep.subr.bf16.mxu1 %v1398_v24  ;;  %v2642_v35 = vsub.f32 %v1986_v36, %v2096_v3 }
 0x1b1   : > { %v1547_v15 = vpop.eup %1546  ;;  %1566 = vpow2.f32 %v911_v12  ;;  %v1404_v8 = vpack.c.bf16 %v1545_v39, %v2320_v2  ;;  %v2640_v12 = vsub.f32 %v1980_v32, %v2096_v3  ;;  %v931_v36 = vmul.f32 1.442695, %v2644_v0 }
 0x1b2   : > { %v2335_v52 = vpop.eup %1548  ;;  %1568 = vpow2.f32 %v913_v38  ;;  %v1402_v21 = vpack.c.bf16 %v1547_v15, %v1543_v48  ;;  %v925_v38 = vmul.f32 1.442695, %v2641_v58  ;;  %v1032_v16 = vadd.f32 %v1539_v42, %v1031_v33 }
 0x1b3   : > { %v1551_v54 = vpop.eup %1550  ;;  %1570 = vpow2.f32 %v915_v25  ;;  %v923_v28 = vmul.f32 1.442695, %v2640_v12  ;;  %v927_v25 = vmul.f32 1.442695, %v2642_v35  ;;  %v996_v41 = vadd.f32 %v2320_v2, %v995_v14  ;;  %1401 = vmatpush1.bf16.msra.mxu1 %v1400_v46  ;;  %v2653_v35 = vld [vmem:[#allocation9_spill] sm:$0xff] }
 0x1b4   : > { %v1553_v61 = vpop.eup %1552  ;;  %1572 = vpow2.f32 %v917_v62  ;;  %v1033_v53 = vadd.f32 %v1543_v48, %v1032_v16  ;;  %v933_v24 = vmul.f32 1.442695, %v2645_v22  ;;  %1403 = vmatprep.subr.bf16.mxu1 %v1402_v21  ;;  %v2646_v48 = vsub.f32 %v1998_v55, %v2096_v3 }
 0x1b5   : > { %v1555_v30 = vpop.eup %1554  ;;  %1574 = vpow2.f32 %v919_v6  ;;  %v1408_v32 = vpack.c.bf16 %v1553_v61, %v2335_v52  ;;  %v997_v44 = vadd.f32 %v1545_v39, %v996_v41  ;;  %v2647_v46 = vsub.f32 %v2001_v59, %v2093_v11 }
 0x1b6   : > { %v2351_v40 = vpop.eup %1556  ;;  %1576 = vpow2.f32 %v921_v26  ;;  %v1406_v42 = vpack.c.bf16 %v1555_v30, %v1551_v54  ;;  %v1034_v4 = vadd.f32 %v1547_v15, %v1033_v53  ;;  %v935_v60 = vmul.f32 1.442695, %v2646_v48 }
 0x1b7   : > { %v1559_v20 = vpop.eup %1558  ;;  %1578 = vpow2.f32 %v923_v28  ;;  %v998_v62 = vadd.f32 %v2335_v52, %v997_v44  ;;  %v937_v51 = vmul.f32 1.442695, %v2647_v46  ;;  %v2648_v6 = vsub.f32 %v2004_v63, %v2096_v3  ;;  %1405 = vmatpush1.bf16.msra.mxu1 %v1404_v8 }
 0x1b8   : > { %v1561_v2 = vpop.eup %1560  ;;  %1580 = vpow2.f32 %v925_v38  ;;  %v1035_v1 = vadd.f32 %v1551_v54, %v1034_v4  ;;  %v941_v26 = vmul.f32 1.442695, %v2649_v10  ;;  %1407 = vmatprep.subr.bf16.mxu1 %v1406_v42  ;;  %v2650_v21 = vsub.f32 %v2587_v23, %v2096_v3 }
 0x1b9   : > { %v1563_v43 = vpop.eup %1562  ;;  %1582 = vpow2.f32 %v927_v25  ;;  %v1412_v47 = vpack.c.bf16 %v1561_v2, %v2351_v40  ;;  %v939_v55 = vmul.f32 1.442695, %v2648_v6  ;;  %v999_v50 = vadd.f32 %v1553_v61, %v998_v62  ;;  %v2661_v62 = vld [vmem:[#allocation13_spill] sm:$0xff] }
 0x1ba   : > { %v2367_v39 = vpop.eup %1564  ;;  %1584 = vpow2.f32 %v929_v34  ;;  %v1410_v15 = vpack.c.bf16 %v1563_v43, %v1559_v20  ;;  %v1036_v33 = vadd.f32 %v1555_v30, %v1035_v1  ;;  %v943_v54 = vmul.f32 1.442695, %v2650_v21 }
 0x1bb   : > { %v1567_v13 = vpop.eup %1566  ;;  %1586 = vpow2.f32 %v931_v36  ;;  %v1000_v12 = vadd.f32 %v2351_v40, %v999_v50  ;;  %v2651_v8 = vsub.f32 %v2588_v45, %v2093_v11  ;;  %v2652_v38 = vsub.f32 %v2589_v7, %v2096_v3  ;;  %1409 = vmatpush1.bf16.msra.mxu1 %v1408_v32  ;;  %v2657_v32 = vld [vmem:[#allocation11_spill] sm:$0xff] }
 0x1bc   : > { %v1569_v52 = vpop.eup %1568  ;;  %1588 = vpow2.f32 %v933_v24  ;;  %v1037_v14 = vadd.f32 %v1559_v20, %v1036_v33  ;;  %v2654_v25 = vsub.f32 %v2653_v35, %v2093_v11  ;;  %1411 = vmatprep.subr.bf16.mxu1 %v1410_v15  ;;  %v2656_v34 = vsub.f32 %v2655_v18, %v2096_v3  ;;  %v2659_v24 = vld [vmem:[#allocation12_spill] sm:$0xff]  ;;  %v2663_v15 = vld [vmem:[#allocation14_spill] sm:$0xff] }
 0x1bd   : > { %v1571_v59 = vpop.eup %1570  ;;  %1590 = vpow2.f32 %v935_v60  ;;  %v1416_v63 = vpack.c.bf16 %v1569_v52, %v2367_v39  ;;  %v945_v5 = vmul.f32 1.442695, %v2651_v8  ;;  %v947_v23 = vmul.f32 1.442695, %v2652_v38 }
 0x1be   : > { %v2383_v28 = vpop.eup %1572  ;;  %1592 = vpow2.f32 %v937_v51  ;;  %v1414_v61 = vpack.c.bf16 %v1571_v59, %v1567_v13  ;;  %v1001_v16 = vadd.f32 %v1561_v2, %v1000_v12  ;;  %v949_v41 = vmul.f32 1.442695, %v2654_v25 }
 0x1bf   : > { %v1575_v58 = vpop.eup %1574  ;;  %1594 = vpow2.f32 %v939_v55  ;;  %v1038_v40 = vadd.f32 %v1563_v43, %v1037_v14  ;;  %v951_v53 = vmul.f32 1.442695, %v2656_v34  ;;  %v2658_v0 = vsub.f32 %v2657_v32, %v2093_v11  ;;  %1413 = vmatpush1.bf16.msra.mxu1 %v1412_v47  ;;  %v2665_v47 = vld [vmem:[#allocation15_spill] sm:$0xff]  ;;  %v2669_v14 = vld [vmem:[#allocation17_spill] sm:$0xff]  ;;  %v2675_v32 = vld [vmem:[#allocation20_spill] sm:$0xff] }
 0x1c0   : > { %v1577_v30 = vpop.eup %1576  ;;  %1596 = vpow2.f32 %v941_v26  ;;  %v1002_v42 = vadd.f32 %v2367_v39, %v1001_v16  ;;  %v2660_v4 = vsub.f32 %v2659_v24, %v2096_v3  ;;  %v2662_v39 = vsub.f32 %v2661_v62, %v2093_v11  ;;  %1415 = vmatprep.subr.bf16.mxu1 %v1414_v61 }
 0x1c1   : > { %v1579_v45 = vpop.eup %1578  ;;  %1598 = vpow2.f32 %v943_v54  ;;  %v1420_v7 = vpack.c.bf16 %v1577_v30, %v2383_v28  ;;  %v953_v36 = vmul.f32 1.442695, %v2658_v0  ;;  %v1039_v44 = vadd.f32 %v1567_v13, %v1038_v40  ;;  %v2667_v54 = vld [vmem:[#allocation16_spill] sm:$0xff] }
 0x1c2   : > { %v2399_v20 = vpop.eup %1580  ;;  %1600 = vpow2.f32 %v945_v5  ;;  %v1418_v2 = vpack.c.bf16 %v1579_v45, %v1575_v58  ;;  %v955_v43 = vmul.f32 1.442695, %v2660_v4  ;;  %v1003_v48 = vadd.f32 %v1569_v52, %v1002_v42 }
 0x1c3   : > { %v1583_v22 = vpop.eup %1582  ;;  %1602 = vpow2.f32 %v947_v23  ;;  %v957_v46 = vmul.f32 1.442695, %v2662_v39  ;;  %v1040_v51 = vadd.f32 %v1571_v59, %v1039_v44  ;;  %v2664_v13 = vsub.f32 %v2663_v15, %v2096_v3  ;;  %1417 = vmatpush1.bf16.msra.mxu1 %v1416_v63  ;;  %v2673_v63 = vld [vmem:[#allocation19_spill] sm:$0xff] }
 0x1c4   : > { %v1585_v60 = vpop.eup %1584  ;;  %1604 = vpow2.f32 %v949_v41  ;;  %v1004_v55 = vadd.f32 %v2383_v28, %v1003_v48  ;;  %v2666_v10 = vsub.f32 %v2665_v47, %v2093_v11  ;;  %v2668_v12 = vsub.f32 %v2667_v54, %v2096_v3  ;;  %1419 = vmatprep.subr.bf16.mxu1 %v1418_v2 }
 0x1c5   : > { %v1587_v1 = vpop.eup %1586  ;;  %1606 = vpow2.f32 %v951_v53  ;;  %v959_v6 = vmul.f32 1.442695, %v2664_v13  ;;  %v1424_v50 = vpack.c.bf16 %v1585_v60, %v2399_v20  ;;  %v1041_v33 = vadd.f32 %v1575_v58, %v1040_v51  ;;  %v2671_v58 = vld [vmem:[#allocation18_spill] sm:$0xff] }
 0x1c6   : > { %v2415_v52 = vpop.eup %1588  ;;  %1608 = vpow2.f32 %v953_v36  ;;  %v961_v26 = vmul.f32 1.442695, %v2666_v10  ;;  %v1422_v59 = vpack.c.bf16 %v1587_v1, %v1583_v22  ;;  %v963_v8 = vmul.f32 1.442695, %v2668_v12 }
 0x1c7   : > { %v1591_v21 = vpop.eup %1590  ;;  %1610 = vpow2.f32 %v955_v43  ;;  %v1005_v5 = vadd.f32 %v1577_v30, %v1004_v55  ;;  %v2670_v61 = vsub.f32 %v2669_v14, %v2093_v11  ;;  %v1042_v23 = vadd.f32 %v1579_v45, %v1041_v33  ;;  %1421 = vmatpush1.bf16.msra.mxu1 %v1420_v7 }
 0x1c8   : > { %v1593_v28 = vpop.eup %1592  ;;  %1612 = vpow2.f32 %v957_v46  ;;  %v2672_v35 = vsub.f32 %v2671_v58, %v2096_v3  ;;  %v2674_v18 = vsub.f32 %v2673_v63, %v2093_v11  ;;  %v2676_v0 = vsub.f32 %v2675_v32, %v2096_v3  ;;  %1423 = vmatprep.subr.bf16.mxu1 %v1422_v59 }
 0x1c9   : > { %v965_v38 = vmul.f32 1.442695, %v2670_v61  ;;  %v1595_v16 = vpop.eup %1594  ;;  %1614 = vpow2.f32 %v959_v6  ;;  %v1006_v41 = vadd.f32 %v2399_v20, %v1005_v5  ;;  %v1428_v40 = vpack.c.bf16 %v1593_v28, %v2415_v52  ;;  %v2686_v61 = vld [vmem:[#allocation28_spill] sm:$0xff] }
 0x1ca   : > { %v967_v25 = vmul.f32 1.442695, %v2672_v35  ;;  %v2431_v30 = vpop.eup %1596  ;;  %1616 = vpow2.f32 %v961_v26  ;;  %v969_v34 = vmul.f32 1.442695, %v2674_v18  ;;  %v1043_v53 = vadd.f32 %v1583_v22, %v1042_v23  ;;  %v2678_v22 = vld [vmem:[#allocation22_spill] sm:$0xff] }
 0x1cb   : > { %v1426_v45 = vpack.c.bf16 %v1595_v16, %v1591_v21  ;;  %v1599_v42 = vpop.eup %1598  ;;  %1618 = vpow2.f32 %v963_v8  ;;  %v971_v36 = vmul.f32 1.442695, %v2676_v0  ;;  %v1007_v44 = vadd.f32 %v1585_v60, %v1006_v41  ;;  %1425 = vmatpush1.bf16.msra.mxu1 %v1424_v50 }
 0x1cc   : > { %v1601_v20 = vpop.eup %1600  ;;  %1620 = vpow2.f32 %v965_v38  ;;  %v2677_v2 = vsub.f32 %v2602_v27, %v2093_v11  ;;  %v1044_v4 = vadd.f32 %v1587_v1, %v1043_v53  ;;  %v2679_v48 = vsub.f32 %v2678_v22, %v2096_v3 }
 0x1cd   : > { %v1603_v43 = vpop.eup %1602  ;;  %1622 = vpow2.f32 %v967_v25  ;;  %v1008_v39 = vadd.f32 %v2415_v52, %v1007_v44  ;;  %v1432_v46 = vpack.c.bf16 %v1601_v20, %v2431_v30  ;;  %v2680_v7 = vsub.f32 %v2604_v9, %v2093_v11  ;;  %v2682_v52 = vld [vmem:[#allocation25_spill] sm:$0xff]  ;;  %1427 = vmatprep.subr.bf16.mxu1 %v1426_v45 }
 0x1ce   : > { %v973_v24 = vmul.f32 1.442695, %v2677_v2  ;;  %v975_v62 = vmul.f32 1.442695, %v2679_v48  ;;  %v1605_v60 = vpop.eup %1604  ;;  %1624 = vpow2.f32 %v969_v34  ;;  %v1045_v27 = vadd.f32 %v1591_v21, %v1044_v4 }
 0x1cf   : > { %v977_v51 = vmul.f32 1.442695, %v2680_v7  ;;  %v1430_v15 = vpack.c.bf16 %v1603_v43, %v1599_v42  ;;  %v1607_v1 = vpop.eup %1606  ;;  %1626 = vpow2.f32 %v971_v36  ;;  %v2681_v13 = vsub.f32 %v2605_v31, %v2096_v3  ;;  %1429 = vmatpush1.bf16.msra.mxu1 %v1428_v40 }
 0x1d0   : > { %v1009_v55 = vadd.f32 %v1593_v28, %v1008_v39  ;;  %v1609_v47 = vpop.eup %1608  ;;  %1628 = vpow2.f32 %v973_v24  ;;  %v2683_v10 = vsub.f32 %v2682_v52, %v2093_v11  ;;  %v1046_v33 = vadd.f32 %v1595_v16, %v1045_v27 }
 0x1d1   : > { %v979_v6 = vmul.f32 1.442695, %v2681_v13  ;;  %v1611_v9 = vpop.eup %1610  ;;  %1630 = vpow2.f32 %v975_v62  ;;  %v2684_v59 = vsub.f32 %v2607_v57, %v2096_v3  ;;  %v1436_v31 = vpack.c.bf16 %v1609_v47, %v1605_v60  ;;  %1431 = vmatprep.subr.bf16.mxu1 %v1430_v15 }
 0x1d2   : > { %v981_v26 = vmul.f32 1.442695, %v2683_v10  ;;  %v1010_v54 = vadd.f32 %v2431_v30, %v1009_v55  ;;  %v1613_v12 = vpop.eup %1612  ;;  %1632 = vpow2.f32 %v977_v51  ;;  %v2685_v50 = vsub.f32 %v2608_v49, %v2093_v11 }
 0x1d3   : > { %v983_v21 = vmul.f32 1.442695, %v2684_v59  ;;  %v1047_v5 = vadd.f32 %v1599_v42, %v1046_v33  ;;  %v1434_v28 = vpack.c.bf16 %v1611_v9, %v1607_v1  ;;  %v1615_v14 = vpop.eup %1614  ;;  %1634 = vpow2.f32 %v979_v6  ;;  %1433 = vmatpush1.bf16.msra.mxu1 %v1432_v46 }
 0x1d4   : > { %v985_v8 = vmul.f32 1.442695, %v2685_v50  ;;  %v2687_v38 = vsub.f32 %v2686_v61, %v2096_v3  ;;  %v1011_v16 = vadd.f32 %v1601_v20, %v1010_v54  ;;  %v1617_v57 = vpop.eup %1616  ;;  %1636 = vpow2.f32 %v981_v26 }
 0x1d5   : > { %v1048_v58 = vadd.f32 %v1603_v43, %v1047_v5  ;;  %v1619_v35 = vpop.eup %1618  ;;  %1638 = vpow2.f32 %v983_v21  ;;  %v1440_v41 = vpack.c.bf16 %v1617_v57, %v1613_v12  ;;  %1435 = vmatprep.subr.bf16.mxu1 %v1434_v28  ;;  %v1104_v21 = vld [vmem:[%s1788_s30] sm:$0xff] }
 0x1d6   : > { %v987_v23 = vmul.f32 1.442695, %v2687_v38  ;;  %v1012_v25 = vadd.f32 %v1605_v60, %v1011_v16  ;;  %v1621_v11 = vpop.eup %1620  ;;  %1640 = vpow2.f32 %v985_v8  ;;  %v1438_v30 = vpack.c.bf16 %v1619_v35, %v1615_v14  ;;  %v2688_v16 = vld [vmem:[#allocation29_spill] sm:$0xff] }
 0x1d7   : > { %v1049_v49 = vadd.f32 %v1607_v1, %v1048_v58  ;;  %v1623_v63 = vpop.eup %1622  ;;  %1437 = vmatpush1.bf16.msra.mxu1 %v1436_v31 }
 0x1d8   : > { %1642 = vpow2.f32 %v987_v23  ;;  %v1013_v18 = vadd.f32 %v1609_v47, %v1012_v25  ;;  %v1625_v3 = vpop.eup %1624  ;;  %1439 = vmatprep.subr.bf16.mxu1 %v1438_v30  ;;  %v989_v23 = vld [vmem:[#allocation3] sm:$0x3] }
 0x1d9   : > { %v1050_v34 = vadd.f32 %v1611_v9, %v1049_v49  ;;  %v1627_v40 = vpop.eup %1626  ;;  %v1444_v45 = vpack.c.bf16 %v1625_v3, %v1621_v11  ;;  %v990_v58 = vmul.f32 %v2267_v29, %v989_v23  ;;  %v1090_v49 = vld [vmem:[#allocation4 + $0x8] sm:$0xff] }
 0x1da   : > { %v1014_v53 = vadd.f32 %v1613_v12, %v1013_v18  ;;  %v1629_v42 = vpop.eup %1628  ;;  %v1442_v0 = vpack.c.bf16 %v1627_v40, %v1623_v63  ;;  %v1103_v18 = vmul.f32 %v1099_v56, %v1090_v49 }
 0x1db   : > { %v1051_v32 = vadd.f32 %v1615_v14, %v1050_v34  ;;  %v1631_v36 = vpop.eup %1630  ;;  %1441 = vmatpush1.bf16.msra.mxu1 %v1440_v41 }
 0x1dc   : > { %v1015_v44 = vadd.f32 %v1617_v57, %v1014_v53  ;;  %v1633_v20 = vpop.eup %1632  ;;  %1443 = vmatprep.subr.bf16.mxu1 %v1442_v0 }
 0x1dd   : > { %v1052_v2 = vadd.f32 %v1619_v35, %v1051_v32  ;;  %v1635_v24 = vpop.eup %1634  ;;  %v1448_v43 = vpack.c.bf16 %v1633_v20, %v1629_v42 }
 0x1de   : > { %v1016_v4 = vadd.f32 %v1621_v11, %v1015_v44  ;;  %v1637_v22 = vpop.eup %1636  ;;  %v1446_v62 = vpack.c.bf16 %v1635_v24, %v1631_v36  ;;  %v1089_v11 = vld [vmem:[#allocation4] sm:$0xff] }
 0x1df   : > { %v1053_v48 = vadd.f32 %v1623_v63, %v1052_v2  ;;  %v1639_v39 = vpop.eup %1638  ;;  %1445 = vmatpush1.bf16.msra.mxu1 %v1444_v45  ;;  %v1102_v30 = vmul.f32 %v1095_v37, %v1089_v11 }
 0x1e0   : > { %v1017_v46 = vadd.f32 %v1625_v3, %v1016_v4  ;;  %v1641_v60 = vpop.eup %1640  ;;  %1447 = vmatprep.subr.bf16.mxu1 %v1446_v62 }
 0x1e1   : > { %v1054_v7 = vadd.f32 %v1627_v40, %v1053_v48  ;;  %v1452_v15 = vpack.c.bf16 %v1641_v60, %v1637_v22 }
 0x1e2   : > { %v1643_v51 = vpop.eup %1642  ;;  %v1018_v27 = vadd.f32 %v1629_v42, %v1017_v46 }
 0x1e3   : > { %v1055_v1 = vadd.f32 %v1631_v36, %v1054_v7  ;;  %v1450_v13 = vpack.c.bf16 %v1643_v51, %v1639_v39  ;;  %1449 = vmatpush1.bf16.msra.mxu1 %v1448_v43 }
 0x1e4   : > { %v1019_v6 = vadd.f32 %v1633_v20, %v1018_v27 }
 0x1e5   : > { %v1056_v55 = vadd.f32 %v1635_v24, %v1055_v1  ;;  %1451 = vmatprep.subr.bf16.mxu1 %v1450_v13 }
 0x1e6   : > { %v1020_v47 = vadd.f32 %v1637_v22, %v1019_v6 }
 0x1e7   : > { %v1057_v52 = vadd.f32 %v1639_v39, %v1056_v55  ;;  %1453 = vmatpush1.bf16.msra.mxu1 %v1452_v15 }
 0x1e8   : > { %v1021_v10 = vadd.f32 %v1641_v60, %v1020_v47 }
 0x1e9   : > { %v1058_v26 = vadd.f32 %v1643_v51, %v1057_v52 }
 0x1ea   : > { %v1022_v33 = vrot.slane %v1021_v10, 4  ;;  %1171 = vmatmul.mubr.f32.vlgmr.msra.gmra.mrb[0].mxu1 %v1104_v21 }
 0x1eb   : > { %v1059_v9 = vrot.slane %v1058_v26, 4 }
 0x1ec   : > { %v1023_v59 = vadd.f32 %v1022_v33, %v1021_v10 }
 0x1ed   : > { %v1060_v54 = vadd.f32 %v1059_v9, %v1058_v26 }
 0x1ee   : > { %v1024_v31 = vrot.slane %v1023_v59, 2 }
 0x1ef   : > { %v1061_v12 = vrot.slane %v1060_v54, 2 }
 0x1f0   : > { %v1025_v50 = vadd.f32 %v1024_v31, %v1023_v59 }
 0x1f1   : > { %v1062_v8 = vadd.f32 %v1061_v12, %v1060_v54 }
 0x1f2   : > { %v1026_v5 = vrot.slane %v1025_v50, 1 }
 0x1f3   : > { %v1063_v28 = vrot.slane %v1062_v8, 1 }
 0x1f4   : > { %v1027_v14 = vadd.f32 %v1026_v5, %v1025_v50 }
 0x1f5   : > { %v1064_v61 = vadd.f32 %v1063_v28, %v1062_v8 }
 0x1f7   : > { %v1067_v38 = vcombine.low %v1027_v14, %v1064_v61 }
 0x1f9   : > { %v1074_v57 = vrot.slane %v1067_v38, %v2688_v16 }
 0x1fb   : > { %v1081_v35 = vrot.slane %v1074_v57, %v2688_v16 }
 0x1fd   : > { %v1083_v25 = vadd.f32 %v1081_v35, %v990_v58 }
 0x1ff   : > { %1088 = vst.msk [vmem:[#allocation3] sm:$0x3] %vm2088_vm2, %v1083_v25 }
 0x206   : > { %v1186_v53 = vld [vmem:[#allocation3] sm:$0x3] (!%p1387_p11) }
 0x207   : > { %1644 = vrcp.f32 (!%p1387_p11), %v1186_v53 }
 0x211   : > { %v1645_v45 = vpop.eup (!%p1387_p11), %1644 }
 0x212   : > { %v1194_v32 = vrot.slane (!%p1387_p11), %v1645_v45, %v2084_v17  ;;  %v1198_v29 = vrot.slane (!%p1387_p11), %v1645_v45, %v2086_v19 }
 0x2bb   : > { %1185 = sbr.rel (%p1387_p11) target bundleno = 716 (0x2cc), region = 40 }
 0x2bd   : > { %v1172_v63 = vpop.f32.mrb[0].mxu1 }
 0x2be   : > { %v1177_v3 = vadd.f32 %v1172_v63, %v1102_v30  ;;  %v1174_v34 = vpop.f32.mrb[1].mxu1 }
 0x2bf   : > { %v1178_v40 = vadd.f32 %v1174_v34, %v1103_v18 }
 0x2c0   : > { %1179 = vst [vmem:[#allocation4] sm:$0xff] %v1177_v3 }
 0x2c1   : > { %1180 = vst [vmem:[#allocation4 + $0x8] sm:$0xff] %v1178_v40 }
 0x2c7   : > { %v1188_v42 = vld [vmem:[#allocation4] sm:$0xff] }
 0x2c8   : > { %v1189_v37 = vld [vmem:[#allocation4 + $0x8] sm:$0xff]  ;;  %v1201_v56 = vmul.f32 %v1194_v32, %v1188_v42 }
 0x2c9   : > { %v1202_v0 = vmul.f32 %v1198_v29, %v1189_v37 }
 0x2ca   : > { %1203 = vst [vmem:[%s1778_s8] sm:$0xff] %v1201_v56 }
 0x2cb   : > { %1204 = vst [vmem:[%s1778_s8 + $0x8] sm:$0xff] %v1202_v0 }
 0x2cc PF: > { %s13_s18 = sadd.s32 1, %s1700_s18   ;;  %s2690_s12 = smov %s1688_s15 }
 0x2cd   : > { %p10_p12 = scmp.ge.s32.totalorder %s13_s18, 18   ;;  %s2691_s13 = smov %s1692_s16 }
 0x2ce   : > { %s2692_s14 = smov %s1696_s17  ;;  %s2693_s15 = smov %s2697_s19 }
 0x2cf   : > { %s2694_s16 = smov %s2701_s20  ;;  %s2695_s17 = smov %s2705_s21 }
 0x2d0   :  { %12 = sbr.rel (!%p10_p12) target bundleno = 4 (0x4), region = 76 }

// kernel: multi_head_attention.5
= control target key start
LH: loop header
LB: loop body
LE: loop exit
PB: predicated region body
PF: predicated region fallthrough
CT: control target
= control target key end

     0   :  { %s900_s9 = smov 0   ;;  %s902_s10 = smov 0   ;;  %s1106_s0 = inlined_call_operand.vmem [shape: f32[512,32], index: 0, kind: input, shape index: {}]   ;;  %s1107_s1 = inlined_call_operand.vmem [shape: f32[32,32], index: 1, kind: input, shape index: {}]   ;;  %s1108_s2 = inlined_call_operand.vmem [shape: f32[512,32], index: 2, kind: output, shape index: {}]  }
   0x1   :  { %s904_s11 = smov 0  }
   0x2 LB: > { %s24_s12 = sadd.s32 1, %s879_s10  ;;  %p686_p0 = scmp.ge.s32.totalorder %s883_s11, 1  ;;  %s883_s11 = sphi %s904_s11, %s12_s11   ;;  %s879_s10 = sphi %s902_s10, %s1112_s10   ;;  %s875_s9 = sphi %s900_s9, %s1111_s9  }
   0x3   : > { %p26_p1 = scmp.ge.s32.totalorder %s24_s12, 2  ;;  %p138_p2 = scmp.lt.s32.totalorder %s883_s11, 3 }
   0x5   : > { %s1114_s12 = smov (%p26_p1, %s24_s12), 0  ;;  %p139_p3 = pnand %p686_p0, %p138_p2 }
   0x6   : > { %v221_v0 = vld [vmem:[%s1107_s1] sm:$0xff] (!%p139_p3)  ;;  %v222_v1 = vld [vmem:[%s1107_s1 + $0x8] sm:$0xff] (!%p139_p3)  ;;  %vm225_vm0 = vcmask (!%p139_p3), 261120   ;;  %v223_v2 = vld [vmem:[%s1107_s1 + $0x10] sm:$0xff] (!%p139_p3)  ;;  %s687_s19 = sshll.u32 (!%p139_p3), %s875_s9, 5 }
   0x7   : > { %142 = sbr.rel (%p139_p3) target bundleno = 268 (0x10c), region = 28  ;;  %v821_v3 = vpack.c.bf16 (!%p139_p3), %v222_v1, %v221_v0  ;;  %vm929_vm1 = vmpackc.low (!%p139_p3), %vm225_vm0, %vm225_vm0  ;;  %v224_v5 = vld [vmem:[%s1107_s1 + $0x18] sm:$0xff] (!%p139_p3)  ;;  %p169_p4 = scmp.lt.s32.totalorder (!%p139_p3), %s687_s19, 63 }
   0x8   : > { %v827_v6 = vpack.c.bf16 (!%p139_p3), %v224_v5, %v223_v2 }
   0x9   : > { %823 = vmatprep.subr.msk.bf16.mxu0 (!%p139_p3), %vm929_vm1, %v821_v3  ;;  %833 = vmatprep.subr.msk.bf16.mxu1 (!%p139_p3), %vm929_vm1, %v821_v3 }
   0xa   : > { %826 = vmatpush3.bf16.xpose.msk.msra.mxu0 (!%p139_p3), %vm929_vm1, %v821_v3  ;;  %835 = vmatpush3.bf16.xpose.msk.msra.mxu1 (!%p139_p3), %vm929_vm1, %v821_v3 }
   0xb   : > { %829 = vmatprep.subr.msk.bf16.mxu0 (!%p139_p3), %vm929_vm1, %v827_v6  ;;  %834 = vmatprep.subr.msk.bf16.mxu1 (!%p139_p3), %vm929_vm1, %v827_v6 }
   0xe   : > { %s1116_s19 = smov (!%p169_p4, %s687_s19), 63 }
   0xf   : > { %s688_s22 = sshll.u32 %s1116_s19, 3 }
  0x10   : > { %s956_s25 = scalar_lea.vmem %s1106_s0, %s688_s22  ;;  %s1031_s28 = scalar_lea.vmem %s1108_s2, %s688_s22 }
  0x11   : > { %v189_v7 = vld [vmem:[%s956_s25] sm:$0xff]  ;;  %v190_v9 = vld [vmem:[%s956_s25 + $0x8] sm:$0xff]  ;;  %v191_v11 = vld [vmem:[%s956_s25 + $0x10] sm:$0xff] }
  0x12   : > { %v205_v8 = vld [vmem:[%s956_s25 + $0x80] sm:$0xff]  ;;  %773 = vmatprep.mubr.msk.f32.mxu0 %vm225_vm0, %v189_v7  ;;  %832 = vmatpush3.bf16.xpose.msk.msra.mxu0 %vm929_vm1, %v827_v6  ;;  %v206_v10 = vld [vmem:[%s956_s25 + $0x88] sm:$0xff]  ;;  %v207_v12 = vld [vmem:[%s956_s25 + $0x90] sm:$0xff] }
  0x13   : > { %797 = vmatprep.mubr.msk.f32.mxu1 %vm225_vm0, %v205_v8  ;;  %836 = vmatpush3.bf16.xpose.msk.msra.mxu1 %vm929_vm1, %v827_v6  ;;  %v192_v13 = vld [vmem:[%s956_s25 + $0x18] sm:$0xff]  ;;  %v193_v15 = vld [vmem:[%s956_s25 + $0x20] sm:$0xff]  ;;  %v194_v17 = vld [vmem:[%s956_s25 + $0x28] sm:$0xff] }
  0x14   : > { %v208_v14 = vld [vmem:[%s956_s25 + $0x98] sm:$0xff]  ;;  %v209_v16 = vld [vmem:[%s956_s25 + $0xa0] sm:$0xff]  ;;  %v210_v18 = vld [vmem:[%s956_s25 + $0xa8] sm:$0xff] }
  0x15   : > { %v195_v19 = vld [vmem:[%s956_s25 + $0x30] sm:$0xff]  ;;  %v196_v21 = vld [vmem:[%s956_s25 + $0x38] sm:$0xff]  ;;  %v197_v23 = vld [vmem:[%s956_s25 + $0x40] sm:$0xff] }
  0x16   : > { %v211_v20 = vld [vmem:[%s956_s25 + $0xb0] sm:$0xff]  ;;  %v212_v22 = vld [vmem:[%s956_s25 + $0xb8] sm:$0xff]  ;;  %v213_v24 = vld [vmem:[%s956_s25 + $0xc0] sm:$0xff] }
  0x17   : > { %v198_v25 = vld [vmem:[%s956_s25 + $0x48] sm:$0xff]  ;;  %v199_v27 = vld [vmem:[%s956_s25 + $0x50] sm:$0xff]  ;;  %v200_v29 = vld [vmem:[%s956_s25 + $0x58] sm:$0xff] }
  0x18   : > { %v214_v26 = vld [vmem:[%s956_s25 + $0xc8] sm:$0xff]  ;;  %v215_v28 = vld [vmem:[%s956_s25 + $0xd0] sm:$0xff]  ;;  %v216_v30 = vld [vmem:[%s956_s25 + $0xd8] sm:$0xff] }
  0x19   : > { %774 = vmatmul.mubr.msk.f32.vlgmr.msra.gmra.mrb[0].mxu0 %vm225_vm0, %v190_v9  ;;  %v201_v31 = vld [vmem:[%s956_s25 + $0x60] sm:$0xff]  ;;  %v202_v33 = vld [vmem:[%s956_s25 + $0x68] sm:$0xff]  ;;  %v203_v35 = vld [vmem:[%s956_s25 + $0x70] sm:$0xff] }
  0x1a   : > { %798 = vmatmul.mubr.msk.f32.vlgmr.msra.gmra.mrb[0].mxu1 %vm225_vm0, %v206_v10  ;;  %776 = vmatprep.mubr.msk.f32.mxu0 %vm225_vm0, %v191_v11  ;;  %v217_v32 = vld [vmem:[%s956_s25 + $0xe0] sm:$0xff]  ;;  %v218_v34 = vld [vmem:[%s956_s25 + $0xe8] sm:$0xff]  ;;  %v219_v36 = vld [vmem:[%s956_s25 + $0xf0] sm:$0xff] }
  0x1b   : > { %800 = vmatprep.mubr.msk.f32.mxu1 %vm225_vm0, %v207_v12  ;;  %v204_v37 = vld [vmem:[%s956_s25 + $0x78] sm:$0xff] }
  0x1c   : > { %v220_v38 = vld [vmem:[%s956_s25 + $0xf8] sm:$0xff] }
  0x1d   : > { %777 = vmatmul.mubr.msk.f32.gmra.mrb[2].mxu0 %vm225_vm0, %v192_v13 }
  0x1e   : > { %801 = vmatmul.mubr.msk.f32.gmra.mrb[2].mxu1 %vm225_vm0, %v208_v14  ;;  %779 = vmatprep.mubr.msk.f32.mxu0 %vm225_vm0, %v193_v15 }
  0x1f   : > { %803 = vmatprep.mubr.msk.f32.mxu1 %vm225_vm0, %v209_v16 }
  0x21   : > { %780 = vmatmul.mubr.msk.f32.gmra.mrb[4].mxu0 %vm225_vm0, %v194_v17 }
  0x22   : > { %804 = vmatmul.mubr.msk.f32.gmra.mrb[4].mxu1 %vm225_vm0, %v210_v18  ;;  %782 = vmatprep.mubr.msk.f32.mxu0 %vm225_vm0, %v195_v19 }
  0x23   : > { %806 = vmatprep.mubr.msk.f32.mxu1 %vm225_vm0, %v211_v20 }
  0x25   : > { %783 = vmatmul.mubr.msk.f32.gmra.mrb[6].mxu0 %vm225_vm0, %v196_v21 }
  0x26   : > { %807 = vmatmul.mubr.msk.f32.gmra.mrb[6].mxu1 %vm225_vm0, %v212_v22  ;;  %785 = vmatprep.mubr.msk.f32.mxu0 %vm225_vm0, %v197_v23 }
  0x27   : > { %809 = vmatprep.mubr.msk.f32.mxu1 %vm225_vm0, %v213_v24 }
  0x29   : > { %786 = vmatmul.mubr.msk.f32.gmra.mrb[8].mxu0 %vm225_vm0, %v198_v25 }
  0x2a   : > { %810 = vmatmul.mubr.msk.f32.gmra.mrb[8].mxu1 %vm225_vm0, %v214_v26  ;;  %788 = vmatprep.mubr.msk.f32.mxu0 %vm225_vm0, %v199_v27 }
  0x2b   : > { %812 = vmatprep.mubr.msk.f32.mxu1 %vm225_vm0, %v215_v28 }
  0x2d   : > { %789 = vmatmul.mubr.msk.f32.gmra.mrb[10].mxu0 %vm225_vm0, %v200_v29 }
  0x2e   : > { %813 = vmatmul.mubr.msk.f32.gmra.mrb[10].mxu1 %vm225_vm0, %v216_v30  ;;  %791 = vmatprep.mubr.msk.f32.mxu0 %vm225_vm0, %v201_v31 }
  0x2f   : > { %815 = vmatprep.mubr.msk.f32.mxu1 %vm225_vm0, %v217_v32 }
  0x31   : > { %792 = vmatmul.mubr.msk.f32.gmra.mrb[12].mxu0 %vm225_vm0, %v202_v33 }
  0x32   : > { %816 = vmatmul.mubr.msk.f32.gmra.mrb[12].mxu1 %vm225_vm0, %v218_v34  ;;  %794 = vmatprep.mubr.msk.f32.mxu0 %vm225_vm0, %v203_v35 }
  0x33   : > { %818 = vmatprep.mubr.msk.f32.mxu1 %vm225_vm0, %v219_v36 }
  0x35   : > { %795 = vmatmul.mubr.msk.f32.gmra.mrb[14].mxu0 %vm225_vm0, %v204_v37 }
  0x36   : > { %819 = vmatmul.mubr.msk.f32.gmra.mrb[14].mxu1 %vm225_vm0, %v220_v38 }
  0xec   : > { %v775_v39 = vpop.f32.mrb[0].mxu0 }
  0xed   : > { %v799_v40 = vpop.f32.mrb[0].mxu1  ;;  %560 = vst.msk [vmem:[%s1031_s28 + $0x8] sm:$0xff] %vm225_vm0, %v775_v39  ;;  %v400_v41 = vpop.f32.mrb[1].mxu0 }
  0xee   : > { %576 = vst.msk [vmem:[%s1031_s28 + $0x88] sm:$0xff] %vm225_vm0, %v799_v40  ;;  %v480_v42 = vpop.f32.mrb[1].mxu1  ;;  %559 = vst.msk [vmem:[%s1031_s28] sm:$0xff] %vm225_vm0, %v400_v41 }
  0xef   : > { %575 = vst.msk [vmem:[%s1031_s28 + $0x80] sm:$0xff] %vm225_vm0, %v480_v42 }
  0xf0   : > { %v778_v43 = vpop.f32.mrb[2].mxu0 }
  0xf1   : > { %v802_v44 = vpop.f32.mrb[2].mxu1  ;;  %562 = vst.msk [vmem:[%s1031_s28 + $0x18] sm:$0xff] %vm225_vm0, %v778_v43  ;;  %v410_v45 = vpop.f32.mrb[3].mxu0 }
  0xf2   : > { %578 = vst.msk [vmem:[%s1031_s28 + $0x98] sm:$0xff] %vm225_vm0, %v802_v44  ;;  %v490_v46 = vpop.f32.mrb[3].mxu1  ;;  %561 = vst.msk [vmem:[%s1031_s28 + $0x10] sm:$0xff] %vm225_vm0, %v410_v45 }
  0xf3   : > { %577 = vst.msk [vmem:[%s1031_s28 + $0x90] sm:$0xff] %vm225_vm0, %v490_v46 }
  0xf4   : > { %v781_v47 = vpop.f32.mrb[4].mxu0 }
  0xf5   : > { %v805_v48 = vpop.f32.mrb[4].mxu1  ;;  %564 = vst.msk [vmem:[%s1031_s28 + $0x28] sm:$0xff] %vm225_vm0, %v781_v47  ;;  %v420_v49 = vpop.f32.mrb[5].mxu0 }
  0xf6   : > { %580 = vst.msk [vmem:[%s1031_s28 + $0xa8] sm:$0xff] %vm225_vm0, %v805_v48  ;;  %v500_v50 = vpop.f32.mrb[5].mxu1  ;;  %563 = vst.msk [vmem:[%s1031_s28 + $0x20] sm:$0xff] %vm225_vm0, %v420_v49 }
  0xf7   : > { %579 = vst.msk [vmem:[%s1031_s28 + $0xa0] sm:$0xff] %vm225_vm0, %v500_v50 }
  0xf8   : > { %v784_v51 = vpop.f32.mrb[6].mxu0 }
  0xf9   : > { %v808_v52 = vpop.f32.mrb[6].mxu1  ;;  %566 = vst.msk [vmem:[%s1031_s28 + $0x38] sm:$0xff] %vm225_vm0, %v784_v51  ;;  %v430_v53 = vpop.f32.mrb[7].mxu0 }
  0xfa   : > { %582 = vst.msk [vmem:[%s1031_s28 + $0xb8] sm:$0xff] %vm225_vm0, %v808_v52  ;;  %v510_v54 = vpop.f32.mrb[7].mxu1  ;;  %565 = vst.msk [vmem:[%s1031_s28 + $0x30] sm:$0xff] %vm225_vm0, %v430_v53 }
  0xfb   : > { %581 = vst.msk [vmem:[%s1031_s28 + $0xb0] sm:$0xff] %vm225_vm0, %v510_v54 }
  0xfc   : > { %v787_v55 = vpop.f32.mrb[8].mxu0 }
  0xfd   : > { %v811_v56 = vpop.f32.mrb[8].mxu1  ;;  %568 = vst.msk [vmem:[%s1031_s28 + $0x48] sm:$0xff] %vm225_vm0, %v787_v55  ;;  %v440_v57 = vpop.f32.mrb[9].mxu0 }
  0xfe   : > { %584 = vst.msk [vmem:[%s1031_s28 + $0xc8] sm:$0xff] %vm225_vm0, %v811_v56  ;;  %v520_v58 = vpop.f32.mrb[9].mxu1  ;;  %567 = vst.msk [vmem:[%s1031_s28 + $0x40] sm:$0xff] %vm225_vm0, %v440_v57 }
  0xff   : > { %583 = vst.msk [vmem:[%s1031_s28 + $0xc0] sm:$0xff] %vm225_vm0, %v520_v58 }
 0x100   : > { %v790_v59 = vpop.f32.mrb[10].mxu0 }
 0x101   : > { %v814_v60 = vpop.f32.mrb[10].mxu1  ;;  %570 = vst.msk [vmem:[%s1031_s28 + $0x58] sm:$0xff] %vm225_vm0, %v790_v59  ;;  %v450_v61 = vpop.f32.mrb[11].mxu0 }
 0x102   : > { %586 = vst.msk [vmem:[%s1031_s28 + $0xd8] sm:$0xff] %vm225_vm0, %v814_v60  ;;  %v530_v62 = vpop.f32.mrb[11].mxu1  ;;  %569 = vst.msk [vmem:[%s1031_s28 + $0x50] sm:$0xff] %vm225_vm0, %v450_v61 }
 0x103   : > { %585 = vst.msk [vmem:[%s1031_s28 + $0xd0] sm:$0xff] %vm225_vm0, %v530_v62 }
 0x104   : > { %v793_v63 = vpop.f32.mrb[12].mxu0 }
 0x105   : > { %v817_v0 = vpop.f32.mrb[12].mxu1  ;;  %572 = vst.msk [vmem:[%s1031_s28 + $0x68] sm:$0xff] %vm225_vm0, %v793_v63  ;;  %v460_v1 = vpop.f32.mrb[13].mxu0 }
 0x106   : > { %588 = vst.msk [vmem:[%s1031_s28 + $0xe8] sm:$0xff] %vm225_vm0, %v817_v0  ;;  %v540_v2 = vpop.f32.mrb[13].mxu1  ;;  %571 = vst.msk [vmem:[%s1031_s28 + $0x60] sm:$0xff] %vm225_vm0, %v460_v1 }
 0x107   : > { %587 = vst.msk [vmem:[%s1031_s28 + $0xe0] sm:$0xff] %vm225_vm0, %v540_v2 }
 0x108   : > { %v796_v3 = vpop.f32.mrb[14].mxu0 }
 0x109   : > { %v820_v4 = vpop.f32.mrb[14].mxu1  ;;  %574 = vst.msk [vmem:[%s1031_s28 + $0x78] sm:$0xff] %vm225_vm0, %v796_v3  ;;  %v470_v5 = vpop.f32.mrb[15].mxu0 }
 0x10a   : > { %590 = vst.msk [vmem:[%s1031_s28 + $0xf8] sm:$0xff] %vm225_vm0, %v820_v4  ;;  %v550_v6 = vpop.f32.mrb[15].mxu1  ;;  %573 = vst.msk [vmem:[%s1031_s28 + $0x70] sm:$0xff] %vm225_vm0, %v470_v5 }
 0x10b   : > { %589 = vst.msk [vmem:[%s1031_s28 + $0xf0] sm:$0xff] %vm225_vm0, %v550_v6 }
 0x10c PF: > { %s12_s11 = sadd.s32 1, %s883_s11   ;;  %s1111_s9 = smov %s879_s10 }
 0x10d   : > { %p9_p5 = scmp.ge.s32.totalorder %s12_s11, 4   ;;  %s1112_s10 = smov %s1114_s12 }
 0x10f   :  { %11 = sbr.rel (!%p9_p5) target bundleno = 2 (0x2), region = 61 }

</bundles_post_ra>
